<compile_context>
chip_gen: v7x
topology: tpu7x:2x2x1
jax: 0.10.0
libtpu: 0.0.40
codegen_flags: <defaults>
</compile_context>

<pallas_src>
import functools
import math

import jax
import jax.numpy as jnp
from jax.experimental import pallas as pl
from jax.experimental.pallas import tpu as pltpu

IN_DIM, HID_DIM, OUT_DIM = 784, 500, 10
IN_PAD, HID_PAD, OUT_PAD = 896, 512, 128


def _round_up(x, m):
    return (x + m - 1) // m * m


def ann2_snn1_kernel(x_ref, w1_ref, b1_ref, w2_ref, b2_ref, w3_ref, b3_ref,
                     out_ref, *, length, alpha, beta, decay_v, threshold,
                     membrane_filter):
    # --- ANN part: three bf16 matmuls, f32 accumulation ---
    x = x_ref[...]                                                  # [TB, 896] bf16
    h1 = jnp.dot(x, w1_ref[...],
                 preferred_element_type=jnp.float32) + b1_ref[...]  # [TB, 512] f32
    h1 = jnp.maximum(h1, 0.0)                                       # ReLU (f32)
    a2 = jnp.dot(h1.astype(jnp.bfloat16), w2_ref[...],
                 preferred_element_type=jnp.float32) + b2_ref[...]
    ann_out = jax.nn.sigmoid(a2)                                    # [TB, 512] f32

    # --- Hoisted projection: psp[t] = c_t * ann_out (zero synapse init +
    #     time-invariant rate code), so weighted[t] = c_t*(ann_out @ W3) + b3 ---
    base = jnp.dot(ann_out.astype(jnp.bfloat16), w3_ref[...],
                   preferred_element_type=jnp.float32)              # [TB, 128] f32
    b3 = jnp.broadcast_to(b3_ref[...], base.shape)                  # hoisted once

    v = jnp.zeros_like(base)
    prev_spk = jnp.zeros_like(base)

    sm_c = 0.0
    ss_c = 0.0
    for t in range(length):                 # fully unrolled (compile-time length)
        sm_c = alpha * sm_c + 1.0           # c_t recurrences are pure Python
        ss_c = beta * ss_c + 1.0
        c_t = sm_c - ss_c
        weighted = c_t * base + b3                                  # [TB, 128]
        if membrane_filter:
            v = decay_v * v * (1.0 - prev_spk) + weighted
        else:
            v = weighted
        spike = (v > threshold).astype(jnp.float32)
        out_ref[t] = spike.astype(out_ref.dtype)    # per-step dense [TB,128] store
        prev_spk = spike


def ann2_snn1_forward(x, params, *, length, tau_m, tau_s, membrane_filter=True,
                      batch_tile=256):
    """x: [B, 784] float32. Returns spikes [B, 10, length] (PyTorch layout)."""
    w1, b1, w2, b2, w3, b3 = params
    batch = x.shape[0]

    # Batch tile: multiple of 16 (bf16 sublane packing), capped at batch_tile
    # (256 matches the v6e/v7x MXU row dim).
    tb = min(batch_tile, _round_up(batch, 16))
    b_pad = _round_up(batch, tb)
    n_tiles = b_pad // tb

    # --- pad to lane-aligned shapes; all matmul weights go in as bf16 ---
    x_p = jnp.pad(x, ((0, b_pad - batch), (0, IN_PAD - IN_DIM))
                  ).astype(jnp.bfloat16)
    w1_p = jnp.pad(w1, ((0, IN_PAD - IN_DIM), (0, HID_PAD - HID_DIM))
                   ).astype(jnp.bfloat16)
    b1_p = jnp.pad(b1, ((0, 0), (0, HID_PAD - HID_DIM)))
    w2_p = jnp.pad(w2, ((0, HID_PAD - HID_DIM), (0, HID_PAD - HID_DIM))
                   ).astype(jnp.bfloat16)
    b2_p = jnp.pad(b2, ((0, 0), (0, HID_PAD - HID_DIM)))
    w3_p = jnp.pad(w3, ((0, HID_PAD - HID_DIM), (0, OUT_PAD - OUT_DIM))
                   ).astype(jnp.bfloat16)
    b3_p = jnp.pad(b3, ((0, 0), (0, OUT_PAD - OUT_DIM)))

    kernel = functools.partial(
        ann2_snn1_kernel,
        length=length,
        alpha=float(math.exp(-1.0 / tau_m)),
        beta=float(math.exp(-1.0 / tau_s)),
        decay_v=float(math.exp(-1.0 / tau_m)),
        threshold=1.0,
        membrane_filter=membrane_filter,
    )

    weight_bytes = ((w1_p.size + w2_p.size + w3_p.size) * 2
                    + (b1_p.size + b2_p.size + b3_p.size) * 4)
    cost = pl.CostEstimate(
        flops=2 * b_pad * (IN_PAD * HID_PAD + HID_PAD * HID_PAD
                           + HID_PAD * OUT_PAD),
        transcendentals=b_pad * HID_PAD,               # sigmoid
        bytes_accessed=(x_p.size * 2 + weight_bytes
                        + length * b_pad * OUT_PAD * 2),
    )

    out_tbo = pl.pallas_call(
        kernel,
        out_shape=jax.ShapeDtypeStruct((length, b_pad, OUT_PAD), jnp.bfloat16),
        grid=(n_tiles,),
        in_specs=[
            pl.BlockSpec((tb, IN_PAD), lambda i: (i, 0)),        # x tile (pipelined)
            pl.BlockSpec((IN_PAD, HID_PAD), lambda i: (0, 0)),   # W1 (resident)
            pl.BlockSpec((1, HID_PAD), lambda i: (0, 0)),        # b1 (resident)
            pl.BlockSpec((HID_PAD, HID_PAD), lambda i: (0, 0)),  # W2 (resident)
            pl.BlockSpec((1, HID_PAD), lambda i: (0, 0)),        # b2 (resident)
            pl.BlockSpec((HID_PAD, OUT_PAD), lambda i: (0, 0)),  # W3 (resident)
            pl.BlockSpec((1, OUT_PAD), lambda i: (0, 0)),        # b3 (resident)
        ],
        out_specs=pl.BlockSpec((length, tb, OUT_PAD), lambda i: (0, i, 0)),
        cost_estimate=cost,
        compiler_params=pltpu.CompilerParams(
            dimension_semantics=("parallel",),         # megacore on v7x
            vmem_limit_bytes=64 * 1024 * 1024,         # resident weights ~1.7 MiB
        ),
    )(x_p, w1_p, b1_p, w2_p, b2_p, w3_p, b3_p)

    # kernel output is [T, B_pad, 128] bf16; slice padding, return [B, 10, T] f32
    return jnp.transpose(out_tbo[:, :batch, :OUT_DIM], (1, 2, 0)
                         ).astype(jnp.float32)


def _linear_init(kw, kb, fan_in, fan_out):
    # PyTorch nn.Linear default init: U(-1/sqrt(fan_in), 1/sqrt(fan_in))
    bound = 1.0 / math.sqrt(fan_in)
    w = jax.random.uniform(kw, (fan_in, fan_out), jnp.float32, -bound, bound)
    b = jax.random.uniform(kb, (1, fan_out), jnp.float32, -bound, bound)
    return w, b


if __name__ == "__main__":
    key = jax.random.PRNGKey(0)
    keys = jax.random.split(key, 7)

    batch = 2          # batch_size
    length = 8         # number of SNN time steps
    tau_m, tau_s = 4, 1

    w1, b1 = _linear_init(keys[0], keys[1], IN_DIM, HID_DIM)   # mlp1
    w2, b2 = _linear_init(keys[2], keys[3], HID_DIM, HID_DIM)  # mlp2
    w3, b3 = _linear_init(keys[4], keys[5], HID_DIM, OUT_DIM)  # snn3 dense

    x = jax.random.uniform(keys[6], (batch, IN_DIM), jnp.float32)

    spikes = ann2_snn1_forward(
        x, (w1, b1, w2, b2, w3, b3),
        length=length, tau_m=tau_m, tau_s=tau_s, membrane_filter=True)
    jax.block_until_ready(spikes)
    assert spikes.shape == (batch, OUT_DIM, length)
    print("KERNEL_OK")
</pallas_src>

<mosaic_0001>
module attributes {stable_mosaic.version = 11 : i64} {
  func.func @ann2_snn1_kernel(%arg0: i32, %arg1: memref<16x896xbf16, #tpu.memory_space<vmem>>, %arg2: memref<896x512xbf16, #tpu.memory_space<vmem>>, %arg3: memref<1x512xf32, #tpu.memory_space<vmem>>, %arg4: memref<512x512xbf16, #tpu.memory_space<vmem>>, %arg5: memref<1x512xf32, #tpu.memory_space<vmem>>, %arg6: memref<512x128xbf16, #tpu.memory_space<vmem>>, %arg7: memref<1x128xf32, #tpu.memory_space<vmem>>, %arg8: memref<8x16x128xbf16, #tpu.memory_space<vmem>>) attributes {dimension_semantics = [#tpu.dimension_semantics<parallel>], iteration_bounds = array<i64: 1>, scalar_prefetch = 0 : i64, scratch_operands = 0 : i64, tpu.core_type = #tpu.core_type<tc>, window_params = [{transform_indices = @transform_0, window_bounds = array<i64: 16, 896>}, {pipeline_mode = #tpu.pipeline_mode<synchronous>, transform_indices = @transform_1, window_bounds = array<i64: 896, 512>}, {pipeline_mode = #tpu.pipeline_mode<synchronous>, transform_indices = @transform_2, window_bounds = array<i64: 1, 512>}, {pipeline_mode = #tpu.pipeline_mode<synchronous>, transform_indices = @transform_3, window_bounds = array<i64: 512, 512>}, {pipeline_mode = #tpu.pipeline_mode<synchronous>, transform_indices = @transform_4, window_bounds = array<i64: 1, 512>}, {pipeline_mode = #tpu.pipeline_mode<synchronous>, transform_indices = @transform_5, window_bounds = array<i64: 512, 128>}, {pipeline_mode = #tpu.pipeline_mode<synchronous>, transform_indices = @transform_6, window_bounds = array<i64: 1, 128>}, {transform_indices = @transform_7, window_bounds = array<i64: 8, 16, 128>}]} {
    %c0 = arith.constant 0 : index
    %c0_0 = arith.constant 0 : index
    %0 = vector.load %arg1[%c0, %c0_0] : memref<16x896xbf16, #tpu.memory_space<vmem>>, vector<16x896xbf16>
    %c0_1 = arith.constant 0 : index
    %c0_2 = arith.constant 0 : index
    %1 = vector.load %arg2[%c0_1, %c0_2] : memref<896x512xbf16, #tpu.memory_space<vmem>>, vector<896x512xbf16>
    %cst = arith.constant dense<0.000000e+00> : vector<16x512xf32>
    %2 = tpu.matmul %0, %1, %cst {dimension_numbers = #tpu.dot_dimension_numbers<[1], [0], [0], [1], [0, 0, 1, 1], [], []>} : vector<16x896xbf16>, vector<896x512xbf16>, vector<16x512xf32> -> vector<16x512xf32>
    %c0_3 = arith.constant 0 : index
    %c0_4 = arith.constant 0 : index
    %3 = vector.load %arg3[%c0_3, %c0_4] : memref<1x512xf32, #tpu.memory_space<vmem>>, vector<1x512xf32>
    %4 = vector.broadcast %3 : vector<1x512xf32> to vector<16x512xf32>
    %5 = arith.addf %2, %4 : vector<16x512xf32>
    %cst_5 = arith.constant 0.000000e+00 : f32
    %6 = vector.broadcast %cst_5 : f32 to vector<16x512xf32>
    %7 = arith.maximumf %5, %6 : vector<16x512xf32>
    %8 = arith.truncf %7 : vector<16x512xf32> to vector<16x512xbf16>
    %c0_6 = arith.constant 0 : index
    %c0_7 = arith.constant 0 : index
    %9 = vector.load %arg4[%c0_6, %c0_7] : memref<512x512xbf16, #tpu.memory_space<vmem>>, vector<512x512xbf16>
    %cst_8 = arith.constant dense<0.000000e+00> : vector<16x512xf32>
    %10 = tpu.matmul %8, %9, %cst_8 {dimension_numbers = #tpu.dot_dimension_numbers<[1], [0], [0], [1], [0, 0, 1, 1], [], []>} : vector<16x512xbf16>, vector<512x512xbf16>, vector<16x512xf32> -> vector<16x512xf32>
    %c0_9 = arith.constant 0 : index
    %c0_10 = arith.constant 0 : index
    %11 = vector.load %arg5[%c0_9, %c0_10] : memref<1x512xf32, #tpu.memory_space<vmem>>, vector<1x512xf32>
    %12 = vector.broadcast %11 : vector<1x512xf32> to vector<16x512xf32>
    %13 = arith.addf %10, %12 : vector<16x512xf32>
    %14 = arith.negf %13 : vector<16x512xf32>
    %15 = math.exp %14 : vector<16x512xf32>
    %cst_11 = arith.constant 1.000000e+00 : f32
    %16 = vector.broadcast %cst_11 : f32 to vector<16x512xf32>
    %17 = arith.addf %16, %15 : vector<16x512xf32>
    %18 = arith.divf %16, %17 : vector<16x512xf32>
    %19 = arith.truncf %18 : vector<16x512xf32> to vector<16x512xbf16>
    %c0_12 = arith.constant 0 : index
    %c0_13 = arith.constant 0 : index
    %20 = vector.load %arg6[%c0_12, %c0_13] : memref<512x128xbf16, #tpu.memory_space<vmem>>, vector<512x128xbf16>
    %cst_14 = arith.constant dense<0.000000e+00> : vector<16x128xf32>
    %21 = tpu.matmul %19, %20, %cst_14 {dimension_numbers = #tpu.dot_dimension_numbers<[1], [0], [0], [1], [0, 0, 1, 1], [], []>} : vector<16x512xbf16>, vector<512x128xbf16>, vector<16x128xf32> -> vector<16x128xf32>
    %c0_15 = arith.constant 0 : index
    %c0_16 = arith.constant 0 : index
    %22 = vector.load %arg7[%c0_15, %c0_16] : memref<1x128xf32, #tpu.memory_space<vmem>>, vector<1x128xf32>
    %23 = vector.shape_cast %22 : vector<1x128xf32> to vector<1x128xf32>
    %24 = vector.broadcast %23 : vector<1x128xf32> to vector<16x128xf32>
    %cst_17 = arith.constant 0.000000e+00 : f32
    %25 = vector.broadcast %cst_17 : f32 to vector<16x128xf32>
    %cst_18 = arith.constant 0.000000e+00 : f32
    %26 = vector.broadcast %cst_18 : f32 to vector<16x128xf32>
    %cst_19 = arith.constant 0.000000e+00 : f32
    %27 = vector.broadcast %cst_19 : f32 to vector<16x128xf32>
    %28 = arith.mulf %27, %21 : vector<16x128xf32>
    %29 = arith.addf %28, %24 : vector<16x128xf32>
    %cst_20 = arith.constant 0.778800785 : f32
    %30 = vector.broadcast %cst_20 : f32 to vector<16x128xf32>
    %31 = arith.mulf %30, %25 : vector<16x128xf32>
    %cst_21 = arith.constant 1.000000e+00 : f32
    %32 = vector.broadcast %cst_21 : f32 to vector<16x128xf32>
    %33 = arith.subf %32, %26 : vector<16x128xf32>
    %34 = arith.mulf %31, %33 : vector<16x128xf32>
    %35 = arith.addf %34, %29 : vector<16x128xf32>
    %cst_22 = arith.constant 1.000000e+00 : f32
    %36 = vector.broadcast %cst_22 : f32 to vector<16x128xf32>
    %37 = arith.cmpf ogt, %35, %36 : vector<16x128xf32>
    %38 = arith.extui %37 : vector<16x128xi1> to vector<16x128xi32>
    %39 = arith.sitofp %38 : vector<16x128xi32> to vector<16x128xf32>
    %40 = arith.truncf %39 : vector<16x128xf32> to vector<16x128xbf16>
    %c0_23 = arith.constant 0 : index
    %c0_24 = arith.constant 0 : index
    %c0_25 = arith.constant 0 : index
    %41 = vector.load %arg8[%c0_23, %c0_24, %c0_25] : memref<8x16x128xbf16, #tpu.memory_space<vmem>>, vector<1x16x128xbf16>
    %42 = vector.shape_cast %41 : vector<1x16x128xbf16> to vector<16x128xbf16>
    %43 = vector.shape_cast %40 : vector<16x128xbf16> to vector<1x16x128xbf16>
    tpu.vector_store %arg8[%c0_23, %c0_24, %c0_25], %43 {strides = array<i32>} : memref<8x16x128xbf16, #tpu.memory_space<vmem>>, vector<1x16x128xbf16>,
    %cst_26 = arith.constant 0.410921335 : f32
    %44 = vector.broadcast %cst_26 : f32 to vector<16x128xf32>
    %45 = arith.mulf %44, %21 : vector<16x128xf32>
    %46 = arith.addf %45, %24 : vector<16x128xf32>
    %cst_27 = arith.constant 0.778800785 : f32
    %47 = vector.broadcast %cst_27 : f32 to vector<16x128xf32>
    %48 = arith.mulf %47, %35 : vector<16x128xf32>
    %cst_28 = arith.constant 1.000000e+00 : f32
    %49 = vector.broadcast %cst_28 : f32 to vector<16x128xf32>
    %50 = arith.subf %49, %39 : vector<16x128xf32>
    %51 = arith.mulf %48, %50 : vector<16x128xf32>
    %52 = arith.addf %51, %46 : vector<16x128xf32>
    %cst_29 = arith.constant 1.000000e+00 : f32
    %53 = vector.broadcast %cst_29 : f32 to vector<16x128xf32>
    %54 = arith.cmpf ogt, %52, %53 : vector<16x128xf32>
    %55 = arith.extui %54 : vector<16x128xi1> to vector<16x128xi32>
    %56 = arith.sitofp %55 : vector<16x128xi32> to vector<16x128xf32>
    %57 = arith.truncf %56 : vector<16x128xf32> to vector<16x128xbf16>
    %c1 = arith.constant 1 : index
    %c0_30 = arith.constant 0 : index
    %c0_31 = arith.constant 0 : index
    %58 = vector.load %arg8[%c1, %c0_30, %c0_31] : memref<8x16x128xbf16, #tpu.memory_space<vmem>>, vector<1x16x128xbf16>
    %59 = vector.shape_cast %58 : vector<1x16x128xbf16> to vector<16x128xbf16>
    %60 = vector.shape_cast %57 : vector<16x128xbf16> to vector<1x16x128xbf16>
    tpu.vector_store %arg8[%c1, %c0_30, %c0_31], %60 {strides = array<i32>} : memref<8x16x128xbf16, #tpu.memory_space<vmem>>, vector<1x16x128xbf16>,
    %cst_32 = arith.constant 0.882116734 : f32
    %61 = vector.broadcast %cst_32 : f32 to vector<16x128xf32>
    %62 = arith.mulf %61, %21 : vector<16x128xf32>
    %63 = arith.addf %62, %24 : vector<16x128xf32>
    %cst_33 = arith.constant 0.778800785 : f32
    %64 = vector.broadcast %cst_33 : f32 to vector<16x128xf32>
    %65 = arith.mulf %64, %52 : vector<16x128xf32>
    %cst_34 = arith.constant 1.000000e+00 : f32
    %66 = vector.broadcast %cst_34 : f32 to vector<16x128xf32>
    %67 = arith.subf %66, %56 : vector<16x128xf32>
    %68 = arith.mulf %65, %67 : vector<16x128xf32>
    %69 = arith.addf %68, %63 : vector<16x128xf32>
    %cst_35 = arith.constant 1.000000e+00 : f32
    %70 = vector.broadcast %cst_35 : f32 to vector<16x128xf32>
    %71 = arith.cmpf ogt, %69, %70 : vector<16x128xf32>
    %72 = arith.extui %71 : vector<16x128xi1> to vector<16x128xi32>
    %73 = arith.sitofp %72 : vector<16x128xi32> to vector<16x128xf32>
    %74 = arith.truncf %73 : vector<16x128xf32> to vector<16x128xbf16>
    %c2 = arith.constant 2 : index
    %c0_36 = arith.constant 0 : index
    %c0_37 = arith.constant 0 : index
    %75 = vector.load %arg8[%c2, %c0_36, %c0_37] : memref<8x16x128xbf16, #tpu.memory_space<vmem>>, vector<1x16x128xbf16>
    %76 = vector.shape_cast %75 : vector<1x16x128xbf16> to vector<16x128xbf16>
    %77 = vector.shape_cast %74 : vector<16x128xbf16> to vector<1x16x128xbf16>
    tpu.vector_store %arg8[%c2, %c0_36, %c0_37], %77 {strides = array<i32>} : memref<8x16x128xbf16, #tpu.memory_space<vmem>>, vector<1x16x128xbf16>,
    %cst_38 = arith.constant 1.3046962 : f32
    %78 = vector.broadcast %cst_38 : f32 to vector<16x128xf32>
    %79 = arith.mulf %78, %21 : vector<16x128xf32>
    %80 = arith.addf %79, %24 : vector<16x128xf32>
    %cst_39 = arith.constant 0.778800785 : f32
    %81 = vector.broadcast %cst_39 : f32 to vector<16x128xf32>
    %82 = arith.mulf %81, %69 : vector<16x128xf32>
    %cst_40 = arith.constant 1.000000e+00 : f32
    %83 = vector.broadcast %cst_40 : f32 to vector<16x128xf32>
    %84 = arith.subf %83, %73 : vector<16x128xf32>
    %85 = arith.mulf %82, %84 : vector<16x128xf32>
    %86 = arith.addf %85, %80 : vector<16x128xf32>
    %cst_41 = arith.constant 1.000000e+00 : f32
    %87 = vector.broadcast %cst_41 : f32 to vector<16x128xf32>
    %88 = arith.cmpf ogt, %86, %87 : vector<16x128xf32>
    %89 = arith.extui %88 : vector<16x128xi1> to vector<16x128xi32>
    %90 = arith.sitofp %89 : vector<16x128xi32> to vector<16x128xf32>
    %91 = arith.truncf %90 : vector<16x128xf32> to vector<16x128xbf16>
    %c3 = arith.constant 3 : index
    %c0_42 = arith.constant 0 : index
    %c0_43 = arith.constant 0 : index
    %92 = vector.load %arg8[%c3, %c0_42, %c0_43] : memref<8x16x128xbf16, #tpu.memory_space<vmem>>, vector<1x16x128xbf16>
    %93 = vector.shape_cast %92 : vector<1x16x128xbf16> to vector<16x128xbf16>
    %94 = vector.shape_cast %91 : vector<16x128xbf16> to vector<1x16x128xbf16>
    tpu.vector_store %arg8[%c3, %c0_42, %c0_43], %94 {strides = array<i32>} : memref<8x16x128xbf16, #tpu.memory_space<vmem>>, vector<1x16x128xbf16>,
    %cst_44 = arith.constant 1.654260e+00 : f32
    %95 = vector.broadcast %cst_44 : f32 to vector<16x128xf32>
    %96 = arith.mulf %95, %21 : vector<16x128xf32>
    %97 = arith.addf %96, %24 : vector<16x128xf32>
    %cst_45 = arith.constant 0.778800785 : f32
    %98 = vector.broadcast %cst_45 : f32 to vector<16x128xf32>
    %99 = arith.mulf %98, %86 : vector<16x128xf32>
    %cst_46 = arith.constant 1.000000e+00 : f32
    %100 = vector.broadcast %cst_46 : f32 to vector<16x128xf32>
    %101 = arith.subf %100, %90 : vector<16x128xf32>
    %102 = arith.mulf %99, %101 : vector<16x128xf32>
    %103 = arith.addf %102, %97 : vector<16x128xf32>
    %cst_47 = arith.constant 1.000000e+00 : f32
    %104 = vector.broadcast %cst_47 : f32 to vector<16x128xf32>
    %105 = arith.cmpf ogt, %103, %104 : vector<16x128xf32>
    %106 = arith.extui %105 : vector<16x128xi1> to vector<16x128xi32>
    %107 = arith.sitofp %106 : vector<16x128xi32> to vector<16x128xf32>
    %108 = arith.truncf %107 : vector<16x128xf32> to vector<16x128xbf16>
    %c4 = arith.constant 4 : index
    %c0_48 = arith.constant 0 : index
    %c0_49 = arith.constant 0 : index
    %109 = vector.load %arg8[%c4, %c0_48, %c0_49] : memref<8x16x128xbf16, #tpu.memory_space<vmem>>, vector<1x16x128xbf16>
    %110 = vector.shape_cast %109 : vector<1x16x128xbf16> to vector<16x128xbf16>
    %111 = vector.shape_cast %108 : vector<16x128xbf16> to vector<1x16x128xbf16>
    tpu.vector_store %arg8[%c4, %c0_48, %c0_49], %111 {strides = array<i32>} : memref<8x16x128xbf16, #tpu.memory_space<vmem>>, vector<1x16x128xbf16>,
    %cst_50 = arith.constant 1.93402684 : f32
    %112 = vector.broadcast %cst_50 : f32 to vector<16x128xf32>
    %113 = arith.mulf %112, %21 : vector<16x128xf32>
    %114 = arith.addf %113, %24 : vector<16x128xf32>
    %cst_51 = arith.constant 0.778800785 : f32
    %115 = vector.broadcast %cst_51 : f32 to vector<16x128xf32>
    %116 = arith.mulf %115, %103 : vector<16x128xf32>
    %cst_52 = arith.constant 1.000000e+00 : f32
    %117 = vector.broadcast %cst_52 : f32 to vector<16x128xf32>
    %118 = arith.subf %117, %107 : vector<16x128xf32>
    %119 = arith.mulf %116, %118 : vector<16x128xf32>
    %120 = arith.addf %119, %114 : vector<16x128xf32>
    %cst_53 = arith.constant 1.000000e+00 : f32
    %121 = vector.broadcast %cst_53 : f32 to vector<16x128xf32>
    %122 = arith.cmpf ogt, %120, %121 : vector<16x128xf32>
    %123 = arith.extui %122 : vector<16x128xi1> to vector<16x128xi32>
    %124 = arith.sitofp %123 : vector<16x128xi32> to vector<16x128xf32>
    %125 = arith.truncf %124 : vector<16x128xf32> to vector<16x128xbf16>
    %c5 = arith.constant 5 : index
    %c0_54 = arith.constant 0 : index
    %c0_55 = arith.constant 0 : index
    %126 = vector.load %arg8[%c5, %c0_54, %c0_55] : memref<8x16x128xbf16, #tpu.memory_space<vmem>>, vector<1x16x128xbf16>
    %127 = vector.shape_cast %126 : vector<1x16x128xbf16> to vector<16x128xbf16>
    %128 = vector.shape_cast %125 : vector<16x128xbf16> to vector<1x16x128xbf16>
    tpu.vector_store %arg8[%c5, %c0_54, %c0_55], %128 {strides = array<i32>} : memref<8x16x128xbf16, #tpu.memory_space<vmem>>, vector<1x16x128xbf16>,
    %cst_56 = arith.constant 2.15467834 : f32
    %129 = vector.broadcast %cst_56 : f32 to vector<16x128xf32>
    %130 = arith.mulf %129, %21 : vector<16x128xf32>
    %131 = arith.addf %130, %24 : vector<16x128xf32>
    %cst_57 = arith.constant 0.778800785 : f32
    %132 = vector.broadcast %cst_57 : f32 to vector<16x128xf32>
    %133 = arith.mulf %132, %120 : vector<16x128xf32>
    %cst_58 = arith.constant 1.000000e+00 : f32
    %134 = vector.broadcast %cst_58 : f32 to vector<16x128xf32>
    %135 = arith.subf %134, %124 : vector<16x128xf32>
    %136 = arith.mulf %133, %135 : vector<16x128xf32>
    %137 = arith.addf %136, %131 : vector<16x128xf32>
    %cst_59 = arith.constant 1.000000e+00 : f32
    %138 = vector.broadcast %cst_59 : f32 to vector<16x128xf32>
    %139 = arith.cmpf ogt, %137, %138 : vector<16x128xf32>
    %140 = arith.extui %139 : vector<16x128xi1> to vector<16x128xi32>
    %141 = arith.sitofp %140 : vector<16x128xi32> to vector<16x128xf32>
    %142 = arith.truncf %141 : vector<16x128xf32> to vector<16x128xbf16>
    %c6 = arith.constant 6 : index
    %c0_60 = arith.constant 0 : index
    %c0_61 = arith.constant 0 : index
    %143 = vector.load %arg8[%c6, %c0_60, %c0_61] : memref<8x16x128xbf16, #tpu.memory_space<vmem>>, vector<1x16x128xbf16>
    %144 = vector.shape_cast %143 : vector<1x16x128xbf16> to vector<16x128xbf16>
    %145 = vector.shape_cast %142 : vector<16x128xbf16> to vector<1x16x128xbf16>
    tpu.vector_store %arg8[%c6, %c0_60, %c0_61], %145 {strides = array<i32>} : memref<8x16x128xbf16, #tpu.memory_space<vmem>>, vector<1x16x128xbf16>,
    %cst_62 = arith.constant 2.3275404 : f32
    %146 = vector.broadcast %cst_62 : f32 to vector<16x128xf32>
    %147 = arith.mulf %146, %21 : vector<16x128xf32>
    %148 = arith.addf %147, %24 : vector<16x128xf32>
    %cst_63 = arith.constant 0.778800785 : f32
    %149 = vector.broadcast %cst_63 : f32 to vector<16x128xf32>
    %150 = arith.mulf %149, %137 : vector<16x128xf32>
    %cst_64 = arith.constant 1.000000e+00 : f32
    %151 = vector.broadcast %cst_64 : f32 to vector<16x128xf32>
    %152 = arith.subf %151, %141 : vector<16x128xf32>
    %153 = arith.mulf %150, %152 : vector<16x128xf32>
    %154 = arith.addf %153, %148 : vector<16x128xf32>
    %cst_65 = arith.constant 1.000000e+00 : f32
    %155 = vector.broadcast %cst_65 : f32 to vector<16x128xf32>
    %156 = arith.cmpf ogt, %154, %155 : vector<16x128xf32>
    %157 = arith.extui %156 : vector<16x128xi1> to vector<16x128xi32>
    %158 = arith.sitofp %157 : vector<16x128xi32> to vector<16x128xf32>
    %159 = arith.truncf %158 : vector<16x128xf32> to vector<16x128xbf16>
    %c7 = arith.constant 7 : index
    %c0_66 = arith.constant 0 : index
    %c0_67 = arith.constant 0 : index
    %160 = vector.load %arg8[%c7, %c0_66, %c0_67] : memref<8x16x128xbf16, #tpu.memory_space<vmem>>, vector<1x16x128xbf16>
    %161 = vector.shape_cast %160 : vector<1x16x128xbf16> to vector<16x128xbf16>
    %162 = vector.shape_cast %159 : vector<16x128xbf16> to vector<1x16x128xbf16>
    tpu.vector_store %arg8[%c7, %c0_66, %c0_67], %162 {strides = array<i32>} : memref<8x16x128xbf16, #tpu.memory_space<vmem>>, vector<1x16x128xbf16>,
    return
  }
  func.func @transform_0(%arg0: i32) -> (i32, i32) {
    %c0_i32 = arith.constant 0 : i32
    %c0_i32_0 = arith.constant 0 : i32
    return %arg0, %c0_i32 : i32, i32
  }
  func.func @transform_1(%arg0: i32) -> (i32, i32) {
    %c0_i32 = arith.constant 0 : i32
    %c0_i32_0 = arith.constant 0 : i32
    %c0_i32_1 = arith.constant 0 : i32
    return %c0_i32, %c0_i32_0 : i32, i32
  }
  func.func @transform_2(%arg0: i32) -> (i32, i32) {
    %c0_i32 = arith.constant 0 : i32
    %c0_i32_0 = arith.constant 0 : i32
    %c0_i32_1 = arith.constant 0 : i32
    return %c0_i32, %c0_i32_0 : i32, i32
  }
  func.func @transform_3(%arg0: i32) -> (i32, i32) {
    %c0_i32 = arith.constant 0 : i32
    %c0_i32_0 = arith.constant 0 : i32
    %c0_i32_1 = arith.constant 0 : i32
    return %c0_i32, %c0_i32_0 : i32, i32
  }
  func.func @transform_4(%arg0: i32) -> (i32, i32) {
    %c0_i32 = arith.constant 0 : i32
    %c0_i32_0 = arith.constant 0 : i32
    %c0_i32_1 = arith.constant 0 : i32
    return %c0_i32, %c0_i32_0 : i32, i32
  }
  func.func @transform_5(%arg0: i32) -> (i32, i32) {
    %c0_i32 = arith.constant 0 : i32
    %c0_i32_0 = arith.constant 0 : i32
    %c0_i32_1 = arith.constant 0 : i32
    return %c0_i32, %c0_i32_0 : i32, i32
  }
  func.func @transform_6(%arg0: i32) -> (i32, i32) {
    %c0_i32 = arith.constant 0 : i32
    %c0_i32_0 = arith.constant 0 : i32
    %c0_i32_1 = arith.constant 0 : i32
    return %c0_i32, %c0_i32_0 : i32, i32
  }
  func.func @transform_7(%arg0: i32) -> (i32, i32, i32) {
    %c0_i32 = arith.constant 0 : i32
    %c0_i32_0 = arith.constant 0 : i32
    %c0_i32_1 = arith.constant 0 : i32
    return %c0_i32, %arg0, %c0_i32_0 : i32, i32, i32
  }
}

</mosaic_0001>

<bundles_post_ra>
// kernel: tpu_custom_call.1
= control target key start
LH: loop header
LB: loop body
LE: loop exit
PB: predicated region body
PF: predicated region fallthrough
CT: control target
= control target key end

     0   :  { %12 = vsyncpa [#allocation3], 0  ;;  %s5093_s0 = inlined_call_operand.hbm [shape: bf16[16,896], index: 0, kind: input, shape index: {}]   ;;  %s5094_s1 = inlined_call_operand.hbm [shape: bf16[896,512], index: 1, kind: input, shape index: {}]   ;;  %s5095_s2 = inlined_call_operand.hbm [shape: f32[1,512], index: 2, kind: input, shape index: {}]   ;;  %s5096_s3 = inlined_call_operand.hbm [shape: bf16[512,512], index: 3, kind: input, shape index: {}]   ;;  %s5097_s4 = inlined_call_operand.hbm [shape: f32[1,512], index: 4, kind: input, shape index: {}]   ;;  %s5098_s5 = inlined_call_operand.hbm [shape: bf16[512,128], index: 5, kind: input, shape index: {}]   ;;  %s5099_s6 = inlined_call_operand.hbm [shape: f32[1,128], index: 6, kind: input, shape index: {}]   ;;  %s5100_s7 = inlined_call_operand.hbm [shape: bf16[8,16,128], index: 7, kind: output, shape index: {}]  }
   0x1   :  { %13 = vsyncpa [#allocation6], 0 }
   0x2   :  { %14 = vsyncpa [#allocation9], 0 }
   0x3   :  { %15 = vsyncpa [#allocation12], 0 }
   0x4   :  { %16 = vsyncpa [#allocation4], 0  ;;  %s4855_s24 = smov [#allocation5]   ;;  %s4669_s28 = scalar_lea.hbm %s5094_s1, 28672 }
   0x5   :  { %s34_s25 = sshll.u32 %s4855_s24, 4  ;;  %p4670_p0 = scmp.ne.s32.totalorder %s5094_s1, %s4669_s28  ;;  %s35_s25 = int_to_ptr.vmem [resolvable:$true] %s34_s25 }
   0x6   :  { %p4673_p1 = scmp.lt.u32.totalorder %s4669_s28, %s5094_s1 }
   0x8   :  { %p4675_p2 = pnand %p4673_p1, %p4670_p0 }
   0xa   :  { %4678 = shalt.err (!%p4675_p2)
}
   0xb   :  { %s4679_s10 = scalar_lea.vmem %s35_s25, 28672  ;;  %p4684_p4 = scmp.lt.s32.totalorder %s35_s25, %s35_s25 }
   0xc   :  { %p4680_p3 = scmp.ne.s32.totalorder %s35_s25, %s4679_s10  ;;  %p4685_p5 = scmp.lt.s32.totalorder %s4679_s10, %s4679_s10 }
   0xe   :  { %p4686_p6 = por %p4685_p5, %p4684_p4 }
  0x10   :  { %p4687_p7 = pnand %p4686_p6, %p4680_p3 }
  0x12   :  { %4690 = shalt.err (!%p4687_p7)
}
  0x13   :  { %s4856_s11 = smov 256   ;;  %s4857_s12 = smov 16  }
  0x14   :  { %40 = dma.hbm_to_vmem [thread:$0]  %s5094_s1, 28672, %s35_s25, [#allocation6], %s4856_s11, %s4856_s11, %s4857_s12  }
  0x15   :  { %s4858_s15 = smov [#allocation8]   ;;  %s4859_s17 = smov [#allocation11]  }
  0x16   :  { %s56_s16 = sshll.u32 %s4858_s15, 4  ;;  %s78_s18 = sshll.u32 %s4859_s17, 4  ;;  %s57_s16 = int_to_ptr.vmem [resolvable:$true] %s56_s16  ;;  %s79_s18 = int_to_ptr.vmem [resolvable:$true] %s78_s18 }
  0x17   :  { %s4691_s21 = scalar_lea.hbm %s5096_s3, 16384 }
  0x18   :  { %p4692_p8 = scmp.ne.s32.totalorder %s5096_s3, %s4691_s21  ;;  %p4695_p9 = scmp.lt.u32.totalorder %s4691_s21, %s5096_s3 }
  0x1a   :  { %p4697_p10 = pnand %p4695_p9, %p4692_p8 }
  0x1c   :  { %4700 = shalt.err (!%p4697_p10)
}
  0x1d   :  { %s4701_s1 = scalar_lea.vmem %s57_s16, 16384  ;;  %p4706_p12 = scmp.lt.s32.totalorder %s57_s16, %s57_s16 }
  0x1e   :  { %p4702_p11 = scmp.ne.s32.totalorder %s57_s16, %s4701_s1  ;;  %p4707_p13 = scmp.lt.s32.totalorder %s4701_s1, %s4701_s1 }
  0x20   :  { %p4708_p0 = por %p4707_p13, %p4706_p12 }
  0x22   :  { %p4709_p1 = pnand %p4708_p0, %p4702_p11 }
  0x24   :  { %4712 = shalt.err (!%p4709_p1)
}
  0x25   :  { %62 = dma.hbm_to_vmem [thread:$0]  %s5096_s3, 16384, %s57_s16, [#allocation9], %s4856_s11, %s4856_s11, %s4857_s12  }
  0x26   :  { %s4713_s30 = scalar_lea.hbm %s5098_s5, 4096 }
  0x27   :  { %p4714_p2 = scmp.ne.s32.totalorder %s5098_s5, %s4713_s30  ;;  %p4717_p3 = scmp.lt.u32.totalorder %s4713_s30, %s5098_s5 }
  0x29   :  { %p4719_p4 = pnand %p4717_p3, %p4714_p2 }
  0x2b   :  { %4722 = shalt.err (!%p4719_p4)
}
  0x2c   :  { %s4723_s14 = scalar_lea.vmem %s79_s18, 4096  ;;  %p4728_p6 = scmp.lt.s32.totalorder %s79_s18, %s79_s18 }
  0x2d   :  { %p4724_p5 = scmp.ne.s32.totalorder %s79_s18, %s4723_s14  ;;  %p4729_p7 = scmp.lt.s32.totalorder %s4723_s14, %s4723_s14 }
  0x2f   :  { %p4730_p8 = por %p4729_p7, %p4728_p6 }
  0x31   :  { %p4731_p9 = pnand %p4730_p8, %p4724_p5 }
  0x33   :  { %4734 = shalt.err (!%p4731_p9)
}
  0x34   :  { %s4860_s3 = smov 64   ;;  %s4861_s11 = smov 4  }
  0x35   :  { %84 = dma.hbm_to_vmem [thread:$0]  %s5098_s5, 4096, %s79_s18, [#allocation12], %s4860_s3, %s4860_s3, %s4861_s11  }
  0x36   :  { %s4862_s16 = smov [#allocation2]   ;;  %s4735_s21 = scalar_lea.hbm %s5093_s0, 896 }
  0x37   :  { %s22_s17 = sshll.u32 %s4862_s16, 4  ;;  %p4736_p10 = scmp.ne.s32.totalorder %s5093_s0, %s4735_s21  ;;  %s23_s17 = int_to_ptr.vmem [resolvable:$true] %s22_s17 }
  0x38   :  { %p4739_p11 = scmp.lt.u32.totalorder %s4735_s21, %s5093_s0 }
  0x3a   :  { %p4741_p12 = pnand %p4739_p11, %p4736_p10 }
  0x3c   :  { %4744 = shalt.err (!%p4741_p12)
}
  0x3d   :  { %s4745_s1 = scalar_lea.vmem %s23_s17, 896  ;;  %p4750_p0 = scmp.lt.s32.totalorder %s23_s17, %s23_s17 }
  0x3e   :  { %p4746_p13 = scmp.ne.s32.totalorder %s23_s17, %s4745_s1  ;;  %p4751_p1 = scmp.lt.s32.totalorder %s4745_s1, %s4745_s1 }
  0x40   :  { %p4752_p2 = por %p4751_p1, %p4750_p0 }
  0x42   :  { %p4753_p3 = pnand %p4752_p2, %p4746_p13 }
  0x44   :  { %4756 = shalt.err (!%p4753_p3)
}
  0x45   :  { %s4863_s5 = smov 448   ;;  %s4864_s18 = smov 28  }
  0x46   :  { %28 = dma.hbm_to_vmem [thread:$0]  %s5093_s0, 896, %s23_s17, [#allocation3], %s4863_s5, %s4863_s5, %s4864_s18  }
  0x47   :  { %s4865_s28 = smov [#allocation7]   ;;  %s4866_s30 = smov [#allocation10]  }
  0x48   :  { %s47_s29 = sshll.u32 %s4865_s28, 4  ;;  %s69_s8 = sshll.u32 %s4866_s30, 4  ;;  %s48_s29 = int_to_ptr.vmem [resolvable:$true] %s47_s29  ;;  %s70_s8 = int_to_ptr.vmem [resolvable:$true] %s69_s8 }
  0x49   :  { %s4757_s13 = scalar_lea.hbm %s5095_s2, 64 }
  0x4a   :  { %p4758_p4 = scmp.ne.s32.totalorder %s5095_s2, %s4757_s13  ;;  %p4761_p5 = scmp.lt.u32.totalorder %s4757_s13, %s5095_s2 }
  0x4c   :  { %p4763_p6 = pnand %p4761_p5, %p4758_p4 }
  0x4e   :  { %4766 = shalt.err (!%p4763_p6)
}
  0x4f   :  { %s4767_s0 = scalar_lea.vmem %s48_s29, 64  ;;  %p4772_p8 = scmp.lt.s32.totalorder %s48_s29, %s48_s29 }
  0x50   :  { %p4768_p7 = scmp.ne.s32.totalorder %s48_s29, %s4767_s0  ;;  %p4773_p9 = scmp.lt.s32.totalorder %s4767_s0, %s4767_s0 }
  0x52   :  { %p4774_p10 = por %p4773_p9, %p4772_p8 }
  0x54   :  { %p4775_p11 = pnand %p4774_p10, %p4768_p7 }
  0x56   :  { %4778 = shalt.err (!%p4775_p11)
}
  0x57   :  { %50 = dma.hbm_to_vmem [thread:$0]  %s5095_s2, 64, %s48_s29, [#allocation6]  }
  0x58   :  { %s4779_s22 = scalar_lea.hbm %s5097_s4, 64 }
  0x59   :  { %p4780_p12 = scmp.ne.s32.totalorder %s5097_s4, %s4779_s22  ;;  %p4783_p13 = scmp.lt.u32.totalorder %s4779_s22, %s5097_s4 }
  0x5b   :  { %p4785_p0 = pnand %p4783_p13, %p4780_p12 }
  0x5d   :  { %4788 = shalt.err (!%p4785_p0)
}
  0x5e   :  { %s4789_s5 = scalar_lea.vmem %s70_s8, 64  ;;  %p4794_p2 = scmp.lt.s32.totalorder %s70_s8, %s70_s8 }
  0x5f   :  { %p4790_p1 = scmp.ne.s32.totalorder %s70_s8, %s4789_s5  ;;  %p4795_p3 = scmp.lt.s32.totalorder %s4789_s5, %s4789_s5 }
  0x61   :  { %p4796_p4 = por %p4795_p3, %p4794_p2 }
  0x63   :  { %p4797_p5 = pnand %p4796_p4, %p4790_p1 }
  0x65   :  { %4800 = shalt.err (!%p4797_p5)
}
  0x66   :  { %72 = dma.hbm_to_vmem [thread:$0]  %s5097_s4, 64, %s70_s8, [#allocation9]  }
  0x67   :  { %s4867_s25 = smov [#allocation13]   ;;  %s4801_s30 = scalar_lea.hbm %s5099_s6, 16 }
  0x68   :  { %s91_s27 = sshll.u32 %s4867_s25, 4  ;;  %p4802_p6 = scmp.ne.s32.totalorder %s5099_s6, %s4801_s30  ;;  %s92_s27 = int_to_ptr.vmem [resolvable:$true] %s91_s27 }
  0x69   :  { %p4805_p7 = scmp.lt.u32.totalorder %s4801_s30, %s5099_s6 }
  0x6b   :  { %p4807_p8 = pnand %p4805_p7, %p4802_p6 }
  0x6d   :  { %4810 = shalt.err (!%p4807_p8)
}
  0x6e   :  { %s4811_s12 = scalar_lea.vmem %s92_s27, 16  ;;  %s4815_s4 = scalar_lea.vmem %s92_s27, 32 }
  0x6f   :  { %p4812_p9 = scmp.ne.s32.totalorder %s92_s27, %s4811_s12  ;;  %p4816_p10 = scmp.lt.s32.totalorder %s92_s27, %s92_s27 }
  0x70   :  { %p4817_p11 = scmp.lt.s32.totalorder %s4815_s4, %s4811_s12 }
  0x72   :  { %p4818_p12 = por %p4817_p11, %p4816_p10 }
  0x74   :  { %p4819_p13 = pnand %p4818_p12, %p4812_p9 }
  0x76   :  { %4822 = shalt.err (!%p4819_p13)
}
  0x77   :  { %94 = dma.hbm_to_vmem [thread:$0]  %s5099_s6, 16, %s92_s27, [#allocation12]  }
  0x78   :  { %4845 = dma.done.wait [#allocation3], 896  }
  0x79   :  { %4846 = vsyncadd [#allocation3], 4294966400 }
  0x7a   :  { %4847 = dma.done.wait [#allocation6], 28736  }
  0x7b   :  { %4848 = vsyncadd [#allocation6], 4294938560 }
  0x7c   :  { %4849 = dma.done.wait [#allocation9], 16448  }
  0x7d   :  { %4850 = vsyncadd [#allocation9], 4294950848 }
  0x7e   :  { %4851 = dma.done.wait [#allocation12], 4112  }
  0x7f   :  { %4852 = vsyncadd [#allocation12], 4294963184  ;;  %v4067_v0 = vld [vmem:[#allocation5 + $0x4] ss:$16 sps:$4 sm:$0xff]   ;;  %v4069_v1 = vld [vmem:[#allocation5 + $0xc] ss:$16 sps:$4 sm:$0xff]  }
  0x80   :  { %1527 = vmatprep.subr.bf16.mxu0 %v4067_v0  ;;  %v4071_v2 = vld [vmem:[#allocation5] ss:$16 sps:$4 sm:$0xff]   ;;  %v4072_v3 = vld [vmem:[#allocation5 + $0x8] ss:$16 sps:$4 sm:$0xff]   ;;  %1699 = vmatprep.subr.bf16.mxu1 %v4069_v1  ;;  %v4073_v4 = vld [vmem:[#allocation5 + $0x24] ss:$16 sps:$4 sm:$0xff]  }
  0x81   :  { %1528 = vmatpush1.bf16.msra.mxu0 %v4071_v2  ;;  %1700 = vmatpush1.bf16.msra.mxu1 %v4072_v3  ;;  %v4075_v5 = vld [vmem:[#allocation5 + $0x2c] ss:$16 sps:$4 sm:$0xff]   ;;  %v4077_v6 = vld [vmem:[#allocation5 + $0x20] ss:$16 sps:$4 sm:$0xff]   ;;  %v4078_v7 = vld [vmem:[#allocation5 + $0x28] ss:$16 sps:$4 sm:$0xff]  }
  0x82   :  { %1529 = vmatprep.subr.bf16.mxu0 %v4073_v4  ;;  %1701 = vmatprep.subr.bf16.mxu1 %v4075_v5  ;;  %v4079_v8 = vld [vmem:[#allocation5 + $0x44] ss:$16 sps:$4 sm:$0xff]   ;;  %v4081_v9 = vld [vmem:[#allocation5 + $0x4c] ss:$16 sps:$4 sm:$0xff]   ;;  %v4083_v10 = vld [vmem:[#allocation5 + $0x40] ss:$16 sps:$4 sm:$0xff]  }
  0x83   :  { %v4084_v11 = vld [vmem:[#allocation5 + $0x48] ss:$16 sps:$4 sm:$0xff]   ;;  %v4085_v12 = vld [vmem:[#allocation5 + $0x64] ss:$16 sps:$4 sm:$0xff]   ;;  %v4087_v13 = vld [vmem:[#allocation5 + $0x6c] ss:$16 sps:$4 sm:$0xff]  }
  0x84   :  { %v4089_v14 = vld [vmem:[#allocation5 + $0x60] ss:$16 sps:$4 sm:$0xff]   ;;  %v4090_v15 = vld [vmem:[#allocation5 + $0x68] ss:$16 sps:$4 sm:$0xff]   ;;  %v4091_v16 = vld [vmem:[#allocation5 + $0x84] ss:$16 sps:$4 sm:$0xff]  }
  0x85   :  { %1530 = vmatpush1.bf16.msra.mxu0 %v4077_v6  ;;  %1702 = vmatpush1.bf16.msra.mxu1 %v4078_v7  ;;  %v4093_v17 = vld [vmem:[#allocation5 + $0x8c] ss:$16 sps:$4 sm:$0xff]   ;;  %v4095_v18 = vld [vmem:[#allocation5 + $0x80] ss:$16 sps:$4 sm:$0xff]   ;;  %v4096_v19 = vld [vmem:[#allocation5 + $0x88] ss:$16 sps:$4 sm:$0xff]  }
  0x86   :  { %1531 = vmatprep.subr.bf16.mxu0 %v4079_v8  ;;  %1703 = vmatprep.subr.bf16.mxu1 %v4081_v9  ;;  %v4097_v20 = vld [vmem:[#allocation5 + $0xa4] ss:$16 sps:$4 sm:$0xff]   ;;  %v4099_v21 = vld [vmem:[#allocation5 + $0xac] ss:$16 sps:$4 sm:$0xff]   ;;  %v4101_v22 = vld [vmem:[#allocation5 + $0xa0] ss:$16 sps:$4 sm:$0xff]  }
  0x87   :  { %v4102_v23 = vld [vmem:[#allocation5 + $0xa8] ss:$16 sps:$4 sm:$0xff]   ;;  %v4103_v24 = vld [vmem:[#allocation5 + $0xc4] ss:$16 sps:$4 sm:$0xff]   ;;  %v4105_v25 = vld [vmem:[#allocation5 + $0xcc] ss:$16 sps:$4 sm:$0xff]  }
  0x88   :  { %v4107_v26 = vld [vmem:[#allocation5 + $0xc0] ss:$16 sps:$4 sm:$0xff]   ;;  %v4108_v27 = vld [vmem:[#allocation5 + $0xc8] ss:$16 sps:$4 sm:$0xff]   ;;  %v4109_v28 = vld [vmem:[#allocation5 + $0xe4] ss:$16 sps:$4 sm:$0xff]  }
  0x89   :  { %1532 = vmatpush1.bf16.msra.mxu0 %v4083_v10  ;;  %1704 = vmatpush1.bf16.msra.mxu1 %v4084_v11  ;;  %v4111_v29 = vld [vmem:[#allocation5 + $0xec] ss:$16 sps:$4 sm:$0xff]   ;;  %v4113_v30 = vld [vmem:[#allocation5 + $0xe0] ss:$16 sps:$4 sm:$0xff]   ;;  %v4114_v31 = vld [vmem:[#allocation5 + $0xe8] ss:$16 sps:$4 sm:$0xff]  }
  0x8a   :  { %1533 = vmatprep.subr.bf16.mxu0 %v4085_v12  ;;  %1705 = vmatprep.subr.bf16.mxu1 %v4087_v13  ;;  %v4115_v32 = vld [vmem:[#allocation5 + $0x104] ss:$16 sps:$4 sm:$0xff]   ;;  %v4117_v33 = vld [vmem:[#allocation5 + $0x10c] ss:$16 sps:$4 sm:$0xff]   ;;  %v4119_v34 = vld [vmem:[#allocation5 + $0x100] ss:$16 sps:$4 sm:$0xff]  }
  0x8b   :  { %v4120_v35 = vld [vmem:[#allocation5 + $0x108] ss:$16 sps:$4 sm:$0xff]   ;;  %v4121_v36 = vld [vmem:[#allocation5 + $0x124] ss:$16 sps:$4 sm:$0xff]   ;;  %v4123_v37 = vld [vmem:[#allocation5 + $0x12c] ss:$16 sps:$4 sm:$0xff]  }
  0x8c   :  { %v4125_v38 = vld [vmem:[#allocation5 + $0x120] ss:$16 sps:$4 sm:$0xff]   ;;  %v4126_v39 = vld [vmem:[#allocation5 + $0x128] ss:$16 sps:$4 sm:$0xff]   ;;  %v4127_v40 = vld [vmem:[#allocation5 + $0x144] ss:$16 sps:$4 sm:$0xff]  }
  0x8d   :  { %1534 = vmatpush1.bf16.msra.mxu0 %v4089_v14  ;;  %1706 = vmatpush1.bf16.msra.mxu1 %v4090_v15  ;;  %v4129_v41 = vld [vmem:[#allocation5 + $0x14c] ss:$16 sps:$4 sm:$0xff]   ;;  %v4131_v42 = vld [vmem:[#allocation5 + $0x140] ss:$16 sps:$4 sm:$0xff]   ;;  %v4132_v43 = vld [vmem:[#allocation5 + $0x148] ss:$16 sps:$4 sm:$0xff]  }
  0x8e   :  { %1535 = vmatprep.subr.bf16.mxu0 %v4091_v16  ;;  %1707 = vmatprep.subr.bf16.mxu1 %v4093_v17  ;;  %v4133_v44 = vld [vmem:[#allocation5 + $0x164] ss:$16 sps:$4 sm:$0xff]   ;;  %v4135_v45 = vld [vmem:[#allocation5 + $0x16c] ss:$16 sps:$4 sm:$0xff]   ;;  %v4137_v46 = vld [vmem:[#allocation5 + $0x160] ss:$16 sps:$4 sm:$0xff]  }
  0x8f   :  { %v4138_v47 = vld [vmem:[#allocation5 + $0x168] ss:$16 sps:$4 sm:$0xff]   ;;  %v4139_v49 = vld [vmem:[#allocation5 + $0x184] ss:$16 sps:$4 sm:$0xff]   ;;  %v4141_v50 = vld [vmem:[#allocation5 + $0x18c] ss:$16 sps:$4 sm:$0xff]  }
  0x90   :  { %v4165_v48 = vld [vmem:[#allocation2 + $0x4] ss:$28 sps:$4 sm:$0xff]   ;;  %v4143_v51 = vld [vmem:[#allocation5 + $0x180] ss:$16 sps:$4 sm:$0xff]   ;;  %v4145_v53 = vld [vmem:[#allocation5 + $0x1a4] ss:$16 sps:$4 sm:$0xff]  }
  0x91   :  { %1536 = vmatpush1.bf16.msra.mxu0 %v4095_v18  ;;  %1708 = vmatpush1.bf16.msra.mxu1 %v4096_v19  ;;  %v4144_v52 = vld [vmem:[#allocation5 + $0x188] ss:$16 sps:$4 sm:$0xff]   ;;  %v4147_v54 = vld [vmem:[#allocation5 + $0x1ac] ss:$16 sps:$4 sm:$0xff]   ;;  %v4149_v55 = vld [vmem:[#allocation5 + $0x1a0] ss:$16 sps:$4 sm:$0xff]  }
  0x92   :  { %1537 = vmatprep.subr.bf16.mxu0 %v4097_v20  ;;  %1709 = vmatprep.subr.bf16.mxu1 %v4099_v21  ;;  %v4150_v56 = vld [vmem:[#allocation5 + $0x1a8] ss:$16 sps:$4 sm:$0xff]   ;;  %v4151_v57 = vld [vmem:[#allocation5 + $0x1c4] ss:$16 sps:$4 sm:$0xff]   ;;  %v4153_v58 = vld [vmem:[#allocation5 + $0x1cc] ss:$16 sps:$4 sm:$0xff]  }
  0x93   :  { %1559 = vmatprep.mubr.bf16.mxu0 %v4165_v48  ;;  %1731 = vmatprep.mubr.bf16.mxu1 %v4165_v48  ;;  %v4155_v59 = vld [vmem:[#allocation5 + $0x1c0] ss:$16 sps:$4 sm:$0xff]   ;;  %v4156_v60 = vld [vmem:[#allocation5 + $0x1c8] ss:$16 sps:$4 sm:$0xff]   ;;  %v4157_v61 = vld [vmem:[#allocation5 + $0x1e4] ss:$16 sps:$4 sm:$0xff]  }
  0x94   :  { %v4159_v62 = vld [vmem:[#allocation5 + $0x1ec] ss:$16 sps:$4 sm:$0xff]   ;;  %v4161_v63 = vld [vmem:[#allocation5 + $0x1e0] ss:$16 sps:$4 sm:$0xff]   ;;  %v4162_v0 = vld [vmem:[#allocation5 + $0x1e8] ss:$16 sps:$4 sm:$0xff]  }
  0x95   :  { %1538 = vmatpush1.bf16.msra.mxu0 %v4101_v22  ;;  %1710 = vmatpush1.bf16.msra.mxu1 %v4102_v23  ;;  %v4168_v1 = vld [vmem:[#allocation5 + $0x204] ss:$16 sps:$4 sm:$0xff]   ;;  %v4171_v2 = vld [vmem:[#allocation5 + $0x20c] ss:$16 sps:$4 sm:$0xff]   ;;  %v4166_v4 = vld [vmem:[#allocation5 + $0x200] ss:$16 sps:$4 sm:$0xff]  }
  0x96   :  { %1539 = vmatprep.subr.bf16.mxu0 %v4103_v24  ;;  %1711 = vmatprep.subr.bf16.mxu1 %v4105_v25  ;;  %v4163_v3 = vld [vmem:[#allocation2] ss:$28 sps:$4 sm:$0xff]   ;;  %v4177_v7 = vld [vmem:[#allocation5 + $0x22c] ss:$16 sps:$4 sm:$0xff]   ;;  %v4172_v8 = vld [vmem:[#allocation5 + $0x220] ss:$16 sps:$4 sm:$0xff]  }
  0x97   :  { %v4169_v5 = vld [vmem:[#allocation5 + $0x208] ss:$16 sps:$4 sm:$0xff]   ;;  %v4174_v6 = vld [vmem:[#allocation5 + $0x224] ss:$16 sps:$4 sm:$0xff]   ;;  %v4183_v11 = vld [vmem:[#allocation5 + $0x24c] ss:$16 sps:$4 sm:$0xff]  }
  0x98   :  { %v4175_v9 = vld [vmem:[#allocation5 + $0x228] ss:$16 sps:$4 sm:$0xff]   ;;  %v4180_v10 = vld [vmem:[#allocation5 + $0x244] ss:$16 sps:$4 sm:$0xff]   ;;  %v4178_v12 = vld [vmem:[#allocation5 + $0x240] ss:$16 sps:$4 sm:$0xff]  }
  0x99   :  { %1540 = vmatpush1.bf16.msra.mxu0 %v4107_v26  ;;  %1712 = vmatpush1.bf16.msra.mxu1 %v4108_v27  ;;  %v4181_v13 = vld [vmem:[#allocation5 + $0x248] ss:$16 sps:$4 sm:$0xff]   ;;  %v4186_v14 = vld [vmem:[#allocation5 + $0x264] ss:$16 sps:$4 sm:$0xff]   ;;  %v4189_v15 = vld [vmem:[#allocation5 + $0x26c] ss:$16 sps:$4 sm:$0xff]  }
  0x9a   :  { %1541 = vmatprep.subr.bf16.mxu0 %v4109_v28  ;;  %1713 = vmatprep.subr.bf16.mxu1 %v4111_v29  ;;  %v4184_v16 = vld [vmem:[#allocation5 + $0x260] ss:$16 sps:$4 sm:$0xff]   ;;  %v4187_v17 = vld [vmem:[#allocation5 + $0x268] ss:$16 sps:$4 sm:$0xff]   ;;  %v4192_v18 = vld [vmem:[#allocation5 + $0x284] ss:$16 sps:$4 sm:$0xff]  }
  0x9b   :  { %v4195_v19 = vld [vmem:[#allocation5 + $0x28c] ss:$16 sps:$4 sm:$0xff]   ;;  %v4190_v20 = vld [vmem:[#allocation5 + $0x280] ss:$16 sps:$4 sm:$0xff]   ;;  %v4193_v21 = vld [vmem:[#allocation5 + $0x288] ss:$16 sps:$4 sm:$0xff]  }
  0x9c   :  { %v4198_v22 = vld [vmem:[#allocation5 + $0x2a4] ss:$16 sps:$4 sm:$0xff]   ;;  %v4201_v23 = vld [vmem:[#allocation5 + $0x2ac] ss:$16 sps:$4 sm:$0xff]   ;;  %v4196_v24 = vld [vmem:[#allocation5 + $0x2a0] ss:$16 sps:$4 sm:$0xff]  }
  0x9d   :  { %1542 = vmatpush1.bf16.msra.mxu0 %v4113_v30  ;;  %1714 = vmatpush1.bf16.msra.mxu1 %v4114_v31  ;;  %v4199_v25 = vld [vmem:[#allocation5 + $0x2a8] ss:$16 sps:$4 sm:$0xff]   ;;  %v4204_v26 = vld [vmem:[#allocation5 + $0x2c4] ss:$16 sps:$4 sm:$0xff]   ;;  %v4207_v27 = vld [vmem:[#allocation5 + $0x2cc] ss:$16 sps:$4 sm:$0xff]  }
  0x9e   :  { %1543 = vmatprep.subr.bf16.mxu0 %v4115_v32  ;;  %1715 = vmatprep.subr.bf16.mxu1 %v4117_v33  ;;  %v4202_v28 = vld [vmem:[#allocation5 + $0x2c0] ss:$16 sps:$4 sm:$0xff]   ;;  %v4205_v29 = vld [vmem:[#allocation5 + $0x2c8] ss:$16 sps:$4 sm:$0xff]   ;;  %v4210_v31 = vld [vmem:[#allocation5 + $0x2e4] ss:$16 sps:$4 sm:$0xff]  }
  0x9f   :  { %v4264_v30 = vld [vmem:[#allocation2 + $0xc] ss:$28 sps:$4 sm:$0xff]   ;;  %v4213_v32 = vld [vmem:[#allocation5 + $0x2ec] ss:$16 sps:$4 sm:$0xff]   ;;  %s4870_s6 = smov [#allocation14]  }
  0xa0   :  { %v4208_v33 = vld [vmem:[#allocation5 + $0x2e0] ss:$16 sps:$4 sm:$0xff]   ;;  %v4237_v48 = vld [vmem:[#allocation5 + $0x36c] ss:$16 sps:$4 sm:$0xff]   ;;  %s3472_s16 = sshll.u32 %s4870_s6, 4  ;;  %s3473_s16 = int_to_ptr.vmem [resolvable:$true] %s3472_s16 }
  0xa1   :  { %1544 = vmatpush1.bf16.msra.mxu0 %v4119_v34  ;;  %1716 = vmatpush1.bf16.msra.mxu1 %v4120_v35  ;;  %v4211_v34 = vld [vmem:[#allocation5 + $0x2e8] ss:$16 sps:$4 sm:$0xff]   ;;  %v4216_v35 = vld [vmem:[#allocation5 + $0x304] ss:$16 sps:$4 sm:$0xff]   ;;  %s4823_s0 = scalar_lea.vmem %s3473_s16, 1024  ;;  %p4828_p1 = scmp.lt.s32.totalorder %s3473_s16, %s3473_s16 }
  0xa2   :  { %1545 = vmatprep.subr.bf16.mxu0 %v4121_v36  ;;  %1717 = vmatprep.subr.bf16.mxu1 %v4123_v37  ;;  %v4219_v36 = vld [vmem:[#allocation5 + $0x30c] ss:$16 sps:$4 sm:$0xff]   ;;  %v4214_v37 = vld [vmem:[#allocation5 + $0x300] ss:$16 sps:$4 sm:$0xff]   ;;  %p4824_p0 = scmp.ne.s32.totalorder %s3473_s16, %s4823_s0  ;;  %p4829_p2 = scmp.lt.s32.totalorder %s4823_s0, %s4823_s0 }
  0xa4   :  { %p4830_p3 = por %p4829_p2, %p4828_p1 }
  0xa5   :  { %1546 = vmatpush1.bf16.msra.mxu0 %v4125_v38  ;;  %1718 = vmatpush1.bf16.msra.mxu1 %v4126_v39  ;;  %v4217_v38 = vld [vmem:[#allocation5 + $0x308] ss:$16 sps:$4 sm:$0xff]   ;;  %v4222_v39 = vld [vmem:[#allocation5 + $0x324] ss:$16 sps:$4 sm:$0xff]  }
  0xa6   :  { %1547 = vmatprep.subr.bf16.mxu0 %v4127_v40  ;;  %1719 = vmatprep.subr.bf16.mxu1 %v4129_v41  ;;  %v4225_v40 = vld [vmem:[#allocation5 + $0x32c] ss:$16 sps:$4 sm:$0xff]   ;;  %v4220_v41 = vld [vmem:[#allocation5 + $0x320] ss:$16 sps:$4 sm:$0xff]   ;;  %p4831_p4 = pnand %p4830_p3, %p4824_p0 }
  0xa9   :  { %1548 = vmatpush1.bf16.msra.mxu0 %v4131_v42  ;;  %1720 = vmatpush1.bf16.msra.mxu1 %v4132_v43  ;;  %v4223_v42 = vld [vmem:[#allocation5 + $0x328] ss:$16 sps:$4 sm:$0xff]   ;;  %v4228_v43 = vld [vmem:[#allocation5 + $0x344] ss:$16 sps:$4 sm:$0xff]  }
  0xaa   :  { %1549 = vmatprep.subr.bf16.mxu0 %v4133_v44  ;;  %1721 = vmatprep.subr.bf16.mxu1 %v4135_v45  ;;  %v4231_v44 = vld [vmem:[#allocation5 + $0x34c] ss:$16 sps:$4 sm:$0xff]   ;;  %v4226_v45 = vld [vmem:[#allocation5 + $0x340] ss:$16 sps:$4 sm:$0xff]  }
  0xad   :  { %1550 = vmatpush1.bf16.msra.mxu0 %v4137_v46  ;;  %1722 = vmatpush1.bf16.msra.mxu1 %v4138_v47  ;;  %v4229_v46 = vld [vmem:[#allocation5 + $0x348] ss:$16 sps:$4 sm:$0xff]   ;;  %v4234_v47 = vld [vmem:[#allocation5 + $0x364] ss:$16 sps:$4 sm:$0xff]  }
  0xae   :  { %1551 = vmatprep.subr.bf16.mxu0 %v4139_v49  ;;  %1723 = vmatprep.subr.bf16.mxu1 %v4141_v50  ;;  %v4232_v49 = vld [vmem:[#allocation5 + $0x360] ss:$16 sps:$4 sm:$0xff]   ;;  %v4235_v50 = vld [vmem:[#allocation5 + $0x368] ss:$16 sps:$4 sm:$0xff]  }
  0xb1   :  { %1552 = vmatpush1.bf16.msra.mxu0 %v4143_v51  ;;  %1724 = vmatpush1.bf16.msra.mxu1 %v4144_v52  ;;  %v4240_v51 = vld [vmem:[#allocation5 + $0x384] ss:$16 sps:$4 sm:$0xff]   ;;  %v4243_v52 = vld [vmem:[#allocation5 + $0x38c] ss:$16 sps:$4 sm:$0xff]  }
  0xb2   :  { %1553 = vmatprep.subr.bf16.mxu0 %v4145_v53  ;;  %1725 = vmatprep.subr.bf16.mxu1 %v4147_v54  ;;  %v4238_v53 = vld [vmem:[#allocation5 + $0x380] ss:$16 sps:$4 sm:$0xff]   ;;  %v4241_v54 = vld [vmem:[#allocation5 + $0x388] ss:$16 sps:$4 sm:$0xff]  }
  0xb5   :  { %1554 = vmatpush1.bf16.msra.mxu0 %v4149_v55  ;;  %1726 = vmatpush1.bf16.msra.mxu1 %v4150_v56  ;;  %v4246_v55 = vld [vmem:[#allocation5 + $0x3a4] ss:$16 sps:$4 sm:$0xff]   ;;  %v4249_v56 = vld [vmem:[#allocation5 + $0x3ac] ss:$16 sps:$4 sm:$0xff]  }
  0xb6   :  { %1555 = vmatprep.subr.bf16.mxu0 %v4151_v57  ;;  %1727 = vmatprep.subr.bf16.mxu1 %v4153_v58  ;;  %v4244_v57 = vld [vmem:[#allocation5 + $0x3a0] ss:$16 sps:$4 sm:$0xff]   ;;  %v4247_v58 = vld [vmem:[#allocation5 + $0x3a8] ss:$16 sps:$4 sm:$0xff]  }
  0xb9   :  { %1556 = vmatpush1.bf16.msra.mxu0 %v4155_v59  ;;  %1728 = vmatpush1.bf16.msra.mxu1 %v4156_v60  ;;  %v4252_v59 = vld [vmem:[#allocation5 + $0x3c4] ss:$16 sps:$4 sm:$0xff]   ;;  %v4255_v60 = vld [vmem:[#allocation5 + $0x3cc] ss:$16 sps:$4 sm:$0xff]  }
  0xba   :  { %1557 = vmatprep.subr.bf16.mxu0 %v4157_v61  ;;  %1729 = vmatprep.subr.bf16.mxu1 %v4159_v62  ;;  %v4250_v61 = vld [vmem:[#allocation5 + $0x3c0] ss:$16 sps:$4 sm:$0xff]   ;;  %v4253_v62 = vld [vmem:[#allocation5 + $0x3c8] ss:$16 sps:$4 sm:$0xff]  }
  0xbd   :  { %1558 = vmatpush1.bf16.msra.mxu0 %v4161_v63  ;;  %1730 = vmatpush1.bf16.msra.mxu1 %v4162_v0  ;;  %v4258_v63 = vld [vmem:[#allocation5 + $0x3e4] ss:$16 sps:$4 sm:$0xff]   ;;  %v4261_v0 = vld [vmem:[#allocation5 + $0x3ec] ss:$16 sps:$4 sm:$0xff]  }
  0xbe   :  { %1570 = vmatprep.subr.bf16.mxu0 %v4168_v1  ;;  %1742 = vmatprep.subr.bf16.mxu1 %v4171_v2  ;;  %v4256_v1 = vld [vmem:[#allocation5 + $0x3e0] ss:$16 sps:$4 sm:$0xff]   ;;  %v4259_v2 = vld [vmem:[#allocation5 + $0x3e8] ss:$16 sps:$4 sm:$0xff]  }
  0xc0   :  { %1560 = vmatmul.mubr.bf16.vlgmr.msra.gmra.mrb[0].mxu0 %v4163_v3  ;;  %1732 = vmatmul.mubr.bf16.vlgmr.msra.gmra.mrb[0].mxu1 %v4163_v3  ;;  %v4267_v3 = vld [vmem:[#allocation5 + $0x404] ss:$16 sps:$4 sm:$0xff]  }
  0xc1   :  { %1571 = vmatpush1.bf16.msra.mxu0 %v4166_v4  ;;  %1743 = vmatpush1.bf16.msra.mxu1 %v4169_v5  ;;  %v4270_v4 = vld [vmem:[#allocation5 + $0x40c] ss:$16 sps:$4 sm:$0xff]  }
  0xc2   :  { %1572 = vmatprep.subr.bf16.mxu0 %v4174_v6  ;;  %1744 = vmatprep.subr.bf16.mxu1 %v4177_v7  ;;  %v4262_v5 = vld [vmem:[#allocation2 + $0x8] ss:$28 sps:$4 sm:$0xff]   ;;  %v4268_v7 = vld [vmem:[#allocation5 + $0x408] ss:$16 sps:$4 sm:$0xff]  }
  0xc3   :  { %1602 = vmatprep.mubr.bf16.mxu0 %v4264_v30  ;;  %1774 = vmatprep.mubr.bf16.mxu1 %v4264_v30  ;;  %v4265_v6 = vld [vmem:[#allocation5 + $0x400] ss:$16 sps:$4 sm:$0xff]   ;;  %v4306_v30 = vld [vmem:[#allocation5 + $0x4cc] ss:$16 sps:$4 sm:$0xff]  }
  0xc5   :  { %1573 = vmatpush1.bf16.msra.mxu0 %v4172_v8  ;;  %1745 = vmatpush1.bf16.msra.mxu1 %v4175_v9  ;;  %v4273_v8 = vld [vmem:[#allocation5 + $0x424] ss:$16 sps:$4 sm:$0xff]   ;;  %v4276_v9 = vld [vmem:[#allocation5 + $0x42c] ss:$16 sps:$4 sm:$0xff]  }
  0xc6   :  { %1574 = vmatprep.subr.bf16.mxu0 %v4180_v10  ;;  %1746 = vmatprep.subr.bf16.mxu1 %v4183_v11  ;;  %v4271_v10 = vld [vmem:[#allocation5 + $0x420] ss:$16 sps:$4 sm:$0xff]   ;;  %v4274_v11 = vld [vmem:[#allocation5 + $0x428] ss:$16 sps:$4 sm:$0xff]  }
  0xc9   :  { %1575 = vmatpush1.bf16.msra.mxu0 %v4178_v12  ;;  %1747 = vmatpush1.bf16.msra.mxu1 %v4181_v13  ;;  %v4363_v12 = vld [vmem:[#allocation2 + $0x14] ss:$28 sps:$4 sm:$0xff]   ;;  %v4279_v13 = vld [vmem:[#allocation5 + $0x444] ss:$16 sps:$4 sm:$0xff]  }
  0xca   :  { %1576 = vmatprep.subr.bf16.mxu0 %v4186_v14  ;;  %1748 = vmatprep.subr.bf16.mxu1 %v4189_v15  ;;  %v4282_v14 = vld [vmem:[#allocation5 + $0x44c] ss:$16 sps:$4 sm:$0xff]   ;;  %v4277_v15 = vld [vmem:[#allocation5 + $0x440] ss:$16 sps:$4 sm:$0xff]  }
  0xcd   :  { %1577 = vmatpush1.bf16.msra.mxu0 %v4184_v16  ;;  %1749 = vmatpush1.bf16.msra.mxu1 %v4187_v17  ;;  %v4280_v16 = vld [vmem:[#allocation5 + $0x448] ss:$16 sps:$4 sm:$0xff]   ;;  %v4285_v17 = vld [vmem:[#allocation5 + $0x464] ss:$16 sps:$4 sm:$0xff]  }
  0xce   :  { %1578 = vmatprep.subr.bf16.mxu0 %v4192_v18  ;;  %1750 = vmatprep.subr.bf16.mxu1 %v4195_v19  ;;  %v4288_v18 = vld [vmem:[#allocation5 + $0x46c] ss:$16 sps:$4 sm:$0xff]   ;;  %v4283_v19 = vld [vmem:[#allocation5 + $0x460] ss:$16 sps:$4 sm:$0xff]  }
  0xd1   :  { %1579 = vmatpush1.bf16.msra.mxu0 %v4190_v20  ;;  %1751 = vmatpush1.bf16.msra.mxu1 %v4193_v21  ;;  %v4286_v20 = vld [vmem:[#allocation5 + $0x468] ss:$16 sps:$4 sm:$0xff]   ;;  %v4291_v21 = vld [vmem:[#allocation5 + $0x484] ss:$16 sps:$4 sm:$0xff]  }
  0xd2   :  { %1580 = vmatprep.subr.bf16.mxu0 %v4198_v22  ;;  %1752 = vmatprep.subr.bf16.mxu1 %v4201_v23  ;;  %v4294_v22 = vld [vmem:[#allocation5 + $0x48c] ss:$16 sps:$4 sm:$0xff]   ;;  %v4289_v23 = vld [vmem:[#allocation5 + $0x480] ss:$16 sps:$4 sm:$0xff]  }
  0xd5   :  { %1581 = vmatpush1.bf16.msra.mxu0 %v4196_v24  ;;  %1753 = vmatpush1.bf16.msra.mxu1 %v4199_v25  ;;  %v4292_v24 = vld [vmem:[#allocation5 + $0x488] ss:$16 sps:$4 sm:$0xff]   ;;  %v4297_v25 = vld [vmem:[#allocation5 + $0x4a4] ss:$16 sps:$4 sm:$0xff]  }
  0xd6   :  { %1582 = vmatprep.subr.bf16.mxu0 %v4204_v26  ;;  %1754 = vmatprep.subr.bf16.mxu1 %v4207_v27  ;;  %v4300_v26 = vld [vmem:[#allocation5 + $0x4ac] ss:$16 sps:$4 sm:$0xff]   ;;  %v4295_v27 = vld [vmem:[#allocation5 + $0x4a0] ss:$16 sps:$4 sm:$0xff]  }
  0xd9   :  { %1583 = vmatpush1.bf16.msra.mxu0 %v4202_v28  ;;  %1755 = vmatpush1.bf16.msra.mxu1 %v4205_v29  ;;  %v4298_v28 = vld [vmem:[#allocation5 + $0x4a8] ss:$16 sps:$4 sm:$0xff]   ;;  %v4303_v29 = vld [vmem:[#allocation5 + $0x4c4] ss:$16 sps:$4 sm:$0xff]  }
  0xda   :  { %1584 = vmatprep.subr.bf16.mxu0 %v4210_v31  ;;  %1756 = vmatprep.subr.bf16.mxu1 %v4213_v32  ;;  %v4301_v31 = vld [vmem:[#allocation5 + $0x4c0] ss:$16 sps:$4 sm:$0xff]   ;;  %v4304_v32 = vld [vmem:[#allocation5 + $0x4c8] ss:$16 sps:$4 sm:$0xff]  }
  0xdd   :  { %1585 = vmatpush1.bf16.msra.mxu0 %v4208_v33  ;;  %1757 = vmatpush1.bf16.msra.mxu1 %v4211_v34  ;;  %v4309_v33 = vld [vmem:[#allocation5 + $0x4e4] ss:$16 sps:$4 sm:$0xff]   ;;  %v4312_v34 = vld [vmem:[#allocation5 + $0x4ec] ss:$16 sps:$4 sm:$0xff]  }
  0xde   :  { %1586 = vmatprep.subr.bf16.mxu0 %v4216_v35  ;;  %1758 = vmatprep.subr.bf16.mxu1 %v4219_v36  ;;  %v4307_v35 = vld [vmem:[#allocation5 + $0x4e0] ss:$16 sps:$4 sm:$0xff]   ;;  %v4310_v36 = vld [vmem:[#allocation5 + $0x4e8] ss:$16 sps:$4 sm:$0xff]  }
  0xe1   :  { %1587 = vmatpush1.bf16.msra.mxu0 %v4214_v37  ;;  %1759 = vmatpush1.bf16.msra.mxu1 %v4217_v38  ;;  %v4315_v37 = vld [vmem:[#allocation5 + $0x504] ss:$16 sps:$4 sm:$0xff]   ;;  %v4318_v38 = vld [vmem:[#allocation5 + $0x50c] ss:$16 sps:$4 sm:$0xff]  }
  0xe2   :  { %1588 = vmatprep.subr.bf16.mxu0 %v4222_v39  ;;  %1760 = vmatprep.subr.bf16.mxu1 %v4225_v40  ;;  %v4313_v39 = vld [vmem:[#allocation5 + $0x500] ss:$16 sps:$4 sm:$0xff]   ;;  %v4316_v40 = vld [vmem:[#allocation5 + $0x508] ss:$16 sps:$4 sm:$0xff]  }
  0xe5   :  { %1589 = vmatpush1.bf16.msra.mxu0 %v4220_v41  ;;  %1761 = vmatpush1.bf16.msra.mxu1 %v4223_v42  ;;  %v4321_v41 = vld [vmem:[#allocation5 + $0x524] ss:$16 sps:$4 sm:$0xff]   ;;  %v4324_v42 = vld [vmem:[#allocation5 + $0x52c] ss:$16 sps:$4 sm:$0xff]  }
  0xe6   :  { %1590 = vmatprep.subr.bf16.mxu0 %v4228_v43  ;;  %1762 = vmatprep.subr.bf16.mxu1 %v4231_v44  ;;  %v4319_v43 = vld [vmem:[#allocation5 + $0x520] ss:$16 sps:$4 sm:$0xff]   ;;  %v4322_v44 = vld [vmem:[#allocation5 + $0x528] ss:$16 sps:$4 sm:$0xff]  }
  0xe9   :  { %1591 = vmatpush1.bf16.msra.mxu0 %v4226_v45  ;;  %1763 = vmatpush1.bf16.msra.mxu1 %v4229_v46  ;;  %v4327_v45 = vld [vmem:[#allocation5 + $0x544] ss:$16 sps:$4 sm:$0xff]   ;;  %v4330_v46 = vld [vmem:[#allocation5 + $0x54c] ss:$16 sps:$4 sm:$0xff]  }
  0xea   :  { %1592 = vmatprep.subr.bf16.mxu0 %v4234_v47  ;;  %1764 = vmatprep.subr.bf16.mxu1 %v4237_v48  ;;  %v4325_v47 = vld [vmem:[#allocation5 + $0x540] ss:$16 sps:$4 sm:$0xff]   ;;  %v4328_v48 = vld [vmem:[#allocation5 + $0x548] ss:$16 sps:$4 sm:$0xff]  }
  0xed   :  { %1593 = vmatpush1.bf16.msra.mxu0 %v4232_v49  ;;  %1765 = vmatpush1.bf16.msra.mxu1 %v4235_v50  ;;  %v4333_v49 = vld [vmem:[#allocation5 + $0x564] ss:$16 sps:$4 sm:$0xff]   ;;  %v4336_v50 = vld [vmem:[#allocation5 + $0x56c] ss:$16 sps:$4 sm:$0xff]  }
  0xee   :  { %1594 = vmatprep.subr.bf16.mxu0 %v4240_v51  ;;  %1766 = vmatprep.subr.bf16.mxu1 %v4243_v52  ;;  %v4331_v51 = vld [vmem:[#allocation5 + $0x560] ss:$16 sps:$4 sm:$0xff]   ;;  %v4334_v52 = vld [vmem:[#allocation5 + $0x568] ss:$16 sps:$4 sm:$0xff]  }
  0xf1   :  { %1595 = vmatpush1.bf16.msra.mxu0 %v4238_v53  ;;  %1767 = vmatpush1.bf16.msra.mxu1 %v4241_v54  ;;  %v4339_v53 = vld [vmem:[#allocation5 + $0x584] ss:$16 sps:$4 sm:$0xff]   ;;  %v4342_v54 = vld [vmem:[#allocation5 + $0x58c] ss:$16 sps:$4 sm:$0xff]  }
  0xf2   :  { %1596 = vmatprep.subr.bf16.mxu0 %v4246_v55  ;;  %1768 = vmatprep.subr.bf16.mxu1 %v4249_v56  ;;  %v4337_v55 = vld [vmem:[#allocation5 + $0x580] ss:$16 sps:$4 sm:$0xff]   ;;  %v4340_v56 = vld [vmem:[#allocation5 + $0x588] ss:$16 sps:$4 sm:$0xff]  }
  0xf5   :  { %1597 = vmatpush1.bf16.msra.mxu0 %v4244_v57  ;;  %1769 = vmatpush1.bf16.msra.mxu1 %v4247_v58  ;;  %v4345_v57 = vld [vmem:[#allocation5 + $0x5a4] ss:$16 sps:$4 sm:$0xff]   ;;  %v4348_v58 = vld [vmem:[#allocation5 + $0x5ac] ss:$16 sps:$4 sm:$0xff]  }
  0xf6   :  { %1598 = vmatprep.subr.bf16.mxu0 %v4252_v59  ;;  %1770 = vmatprep.subr.bf16.mxu1 %v4255_v60  ;;  %v4343_v59 = vld [vmem:[#allocation5 + $0x5a0] ss:$16 sps:$4 sm:$0xff]   ;;  %v4346_v60 = vld [vmem:[#allocation5 + $0x5a8] ss:$16 sps:$4 sm:$0xff]  }
  0xf9   :  { %1599 = vmatpush1.bf16.msra.mxu0 %v4250_v61  ;;  %1771 = vmatpush1.bf16.msra.mxu1 %v4253_v62  ;;  %v4351_v61 = vld [vmem:[#allocation5 + $0x5c4] ss:$16 sps:$4 sm:$0xff]   ;;  %v4354_v62 = vld [vmem:[#allocation5 + $0x5cc] ss:$16 sps:$4 sm:$0xff]  }
  0xfa   :  { %1600 = vmatprep.subr.bf16.mxu0 %v4258_v63  ;;  %1772 = vmatprep.subr.bf16.mxu1 %v4261_v0  ;;  %v4349_v63 = vld [vmem:[#allocation5 + $0x5c0] ss:$16 sps:$4 sm:$0xff]   ;;  %v4352_v0 = vld [vmem:[#allocation5 + $0x5c8] ss:$16 sps:$4 sm:$0xff]  }
  0xfd   :  { %1601 = vmatpush1.bf16.msra.mxu0 %v4256_v1  ;;  %1773 = vmatpush1.bf16.msra.mxu1 %v4259_v2  ;;  %v4357_v1 = vld [vmem:[#allocation5 + $0x5e4] ss:$16 sps:$4 sm:$0xff]   ;;  %v4360_v2 = vld [vmem:[#allocation5 + $0x5ec] ss:$16 sps:$4 sm:$0xff]  }
  0xfe   :  { %1613 = vmatprep.subr.bf16.mxu0 %v4267_v3  ;;  %1785 = vmatprep.subr.bf16.mxu1 %v4270_v4  ;;  %v4355_v3 = vld [vmem:[#allocation5 + $0x5e0] ss:$16 sps:$4 sm:$0xff]   ;;  %v4358_v4 = vld [vmem:[#allocation5 + $0x5e8] ss:$16 sps:$4 sm:$0xff]  }
 0x100   :  { %1603 = vmatmul.mubr.bf16.vlgmr.msra.gmra.mrb[0].mxu0 %v4262_v5  ;;  %1775 = vmatmul.mubr.bf16.vlgmr.msra.gmra.mrb[0].mxu1 %v4262_v5  ;;  %v4366_v5 = vld [vmem:[#allocation5 + $0x604] ss:$16 sps:$4 sm:$0xff]  }
 0x101   :  { %1614 = vmatpush1.bf16.msra.mxu0 %v4265_v6  ;;  %1786 = vmatpush1.bf16.msra.mxu1 %v4268_v7  ;;  %v4361_v6 = vld [vmem:[#allocation2 + $0x10] ss:$28 sps:$4 sm:$0xff]   ;;  %v4369_v7 = vld [vmem:[#allocation5 + $0x60c] ss:$16 sps:$4 sm:$0xff]  }
 0x102   :  { %1615 = vmatprep.subr.bf16.mxu0 %v4273_v8  ;;  %1787 = vmatprep.subr.bf16.mxu1 %v4276_v9  ;;  %v4364_v8 = vld [vmem:[#allocation5 + $0x600] ss:$16 sps:$4 sm:$0xff]   ;;  %v4367_v9 = vld [vmem:[#allocation5 + $0x608] ss:$16 sps:$4 sm:$0xff]  }
 0x103   :  { %1645 = vmatprep.mubr.bf16.mxu0 %v4363_v12  ;;  %1817 = vmatprep.mubr.bf16.mxu1 %v4363_v12  ;;  %v4370_v12 = vld [vmem:[#allocation5 + $0x620] ss:$16 sps:$4 sm:$0xff]  }
 0x105   :  { %1616 = vmatpush1.bf16.msra.mxu0 %v4271_v10  ;;  %1788 = vmatpush1.bf16.msra.mxu1 %v4274_v11  ;;  %v4372_v10 = vld [vmem:[#allocation5 + $0x624] ss:$16 sps:$4 sm:$0xff]   ;;  %v4375_v11 = vld [vmem:[#allocation5 + $0x62c] ss:$16 sps:$4 sm:$0xff]  }
 0x106   :  { %1617 = vmatprep.subr.bf16.mxu0 %v4279_v13  ;;  %1789 = vmatprep.subr.bf16.mxu1 %v4282_v14  ;;  %v4373_v13 = vld [vmem:[#allocation5 + $0x628] ss:$16 sps:$4 sm:$0xff]   ;;  %v4378_v14 = vld [vmem:[#allocation5 + $0x644] ss:$16 sps:$4 sm:$0xff]  }
 0x109   :  { %1618 = vmatpush1.bf16.msra.mxu0 %v4277_v15  ;;  %1790 = vmatpush1.bf16.msra.mxu1 %v4280_v16  ;;  %v4381_v15 = vld [vmem:[#allocation5 + $0x64c] ss:$16 sps:$4 sm:$0xff]   ;;  %v4376_v16 = vld [vmem:[#allocation5 + $0x640] ss:$16 sps:$4 sm:$0xff]  }
 0x10a   :  { %1619 = vmatprep.subr.bf16.mxu0 %v4285_v17  ;;  %1791 = vmatprep.subr.bf16.mxu1 %v4288_v18  ;;  %v4379_v17 = vld [vmem:[#allocation5 + $0x648] ss:$16 sps:$4 sm:$0xff]   ;;  %v4868_v18 = vmov 0  }
 0x10d   :  { %1620 = vmatpush1.bf16.msra.mxu0 %v4283_v19  ;;  %1792 = vmatpush1.bf16.msra.mxu1 %v4286_v20  ;;  %v4384_v19 = vld [vmem:[#allocation5 + $0x664] ss:$16 sps:$4 sm:$0xff]   ;;  %v4387_v20 = vld [vmem:[#allocation5 + $0x66c] ss:$16 sps:$4 sm:$0xff]  }
 0x10e   :  { %1621 = vmatprep.subr.bf16.mxu0 %v4291_v21  ;;  %1793 = vmatprep.subr.bf16.mxu1 %v4294_v22  ;;  %v4382_v21 = vld [vmem:[#allocation5 + $0x660] ss:$16 sps:$4 sm:$0xff]   ;;  %v4385_v22 = vld [vmem:[#allocation5 + $0x668] ss:$16 sps:$4 sm:$0xff]  }
 0x111   :  { %1622 = vmatpush1.bf16.msra.mxu0 %v4289_v23  ;;  %1794 = vmatpush1.bf16.msra.mxu1 %v4292_v24  ;;  %v4390_v23 = vld [vmem:[#allocation5 + $0x684] ss:$16 sps:$4 sm:$0xff]   ;;  %v4393_v24 = vld [vmem:[#allocation5 + $0x68c] ss:$16 sps:$4 sm:$0xff]  }
 0x112   :  { %1623 = vmatprep.subr.bf16.mxu0 %v4297_v25  ;;  %1795 = vmatprep.subr.bf16.mxu1 %v4300_v26  ;;  %v4388_v25 = vld [vmem:[#allocation5 + $0x680] ss:$16 sps:$4 sm:$0xff]   ;;  %v4391_v26 = vld [vmem:[#allocation5 + $0x688] ss:$16 sps:$4 sm:$0xff]  }
 0x115   :  { %1624 = vmatpush1.bf16.msra.mxu0 %v4295_v27  ;;  %1796 = vmatpush1.bf16.msra.mxu1 %v4298_v28  ;;  %v4396_v27 = vld [vmem:[#allocation5 + $0x6a4] ss:$16 sps:$4 sm:$0xff]   ;;  %v4399_v28 = vld [vmem:[#allocation5 + $0x6ac] ss:$16 sps:$4 sm:$0xff]  }
 0x116   :  { %1625 = vmatprep.subr.bf16.mxu0 %v4303_v29  ;;  %1797 = vmatprep.subr.bf16.mxu1 %v4306_v30  ;;  %v4394_v29 = vld [vmem:[#allocation5 + $0x6a0] ss:$16 sps:$4 sm:$0xff]   ;;  %v4397_v30 = vld [vmem:[#allocation5 + $0x6a8] ss:$16 sps:$4 sm:$0xff]  }
 0x119   :  { %1626 = vmatpush1.bf16.msra.mxu0 %v4301_v31  ;;  %1798 = vmatpush1.bf16.msra.mxu1 %v4304_v32  ;;  %v4402_v31 = vld [vmem:[#allocation5 + $0x6c4] ss:$16 sps:$4 sm:$0xff]   ;;  %v4405_v32 = vld [vmem:[#allocation5 + $0x6cc] ss:$16 sps:$4 sm:$0xff]  }
 0x11a   :  { %1627 = vmatprep.subr.bf16.mxu0 %v4309_v33  ;;  %1799 = vmatprep.subr.bf16.mxu1 %v4312_v34  ;;  %v4400_v33 = vld [vmem:[#allocation5 + $0x6c0] ss:$16 sps:$4 sm:$0xff]   ;;  %v4403_v34 = vld [vmem:[#allocation5 + $0x6c8] ss:$16 sps:$4 sm:$0xff]  }
 0x11d   :  { %1628 = vmatpush1.bf16.msra.mxu0 %v4307_v35  ;;  %1800 = vmatpush1.bf16.msra.mxu1 %v4310_v36  ;;  %v4408_v35 = vld [vmem:[#allocation5 + $0x6e4] ss:$16 sps:$4 sm:$0xff]   ;;  %v4411_v36 = vld [vmem:[#allocation5 + $0x6ec] ss:$16 sps:$4 sm:$0xff]  }
 0x11e   :  { %1629 = vmatprep.subr.bf16.mxu0 %v4315_v37  ;;  %1801 = vmatprep.subr.bf16.mxu1 %v4318_v38  ;;  %v4406_v37 = vld [vmem:[#allocation5 + $0x6e0] ss:$16 sps:$4 sm:$0xff]   ;;  %v4409_v38 = vld [vmem:[#allocation5 + $0x6e8] ss:$16 sps:$4 sm:$0xff]  }
 0x121   :  { %1630 = vmatpush1.bf16.msra.mxu0 %v4313_v39  ;;  %1802 = vmatpush1.bf16.msra.mxu1 %v4316_v40  ;;  %v4415_v39 = vld [vmem:[#allocation8 + $0x4] ss:$16 sps:$4 sm:$0xff]   ;;  %v4418_v40 = vld [vmem:[#allocation8 + $0xc] ss:$16 sps:$4 sm:$0xff]  }
 0x122   :  { %1631 = vmatprep.subr.bf16.mxu0 %v4321_v41  ;;  %1803 = vmatprep.subr.bf16.mxu1 %v4324_v42  ;;  %v4412_v41 = vld [vmem:[#allocation2 + $0x18] ss:$28 sps:$4 sm:$0xff]   ;;  %v4413_v42 = vld [vmem:[#allocation8] ss:$16 sps:$4 sm:$0xff]  }
 0x125   :  { %1632 = vmatpush1.bf16.msra.mxu0 %v4319_v43  ;;  %1804 = vmatpush1.bf16.msra.mxu1 %v4322_v44  ;;  %v4416_v43 = vld [vmem:[#allocation8 + $0x8] ss:$16 sps:$4 sm:$0xff]   ;;  %v4421_v44 = vld [vmem:[#allocation8 + $0x24] ss:$16 sps:$4 sm:$0xff]  }
 0x126   :  { %1633 = vmatprep.subr.bf16.mxu0 %v4327_v45  ;;  %1805 = vmatprep.subr.bf16.mxu1 %v4330_v46  ;;  %v4424_v45 = vld [vmem:[#allocation8 + $0x2c] ss:$16 sps:$4 sm:$0xff]   ;;  %v4419_v46 = vld [vmem:[#allocation8 + $0x20] ss:$16 sps:$4 sm:$0xff]  }
 0x129   :  { %1634 = vmatpush1.bf16.msra.mxu0 %v4325_v47  ;;  %1806 = vmatpush1.bf16.msra.mxu1 %v4328_v48  ;;  %v4422_v47 = vld [vmem:[#allocation8 + $0x28] ss:$16 sps:$4 sm:$0xff]   ;;  %v4427_v48 = vld [vmem:[#allocation8 + $0x44] ss:$16 sps:$4 sm:$0xff]  }
 0x12a   :  { %1635 = vmatprep.subr.bf16.mxu0 %v4333_v49  ;;  %1807 = vmatprep.subr.bf16.mxu1 %v4336_v50  ;;  %v4430_v49 = vld [vmem:[#allocation8 + $0x4c] ss:$16 sps:$4 sm:$0xff]   ;;  %v4425_v50 = vld [vmem:[#allocation8 + $0x40] ss:$16 sps:$4 sm:$0xff]  }
 0x12d   :  { %1636 = vmatpush1.bf16.msra.mxu0 %v4331_v51  ;;  %1808 = vmatpush1.bf16.msra.mxu1 %v4334_v52  ;;  %v4428_v51 = vld [vmem:[#allocation8 + $0x48] ss:$16 sps:$4 sm:$0xff]   ;;  %v4433_v52 = vld [vmem:[#allocation8 + $0x64] ss:$16 sps:$4 sm:$0xff]  }
 0x12e   :  { %1637 = vmatprep.subr.bf16.mxu0 %v4339_v53  ;;  %1809 = vmatprep.subr.bf16.mxu1 %v4342_v54  ;;  %v4436_v53 = vld [vmem:[#allocation8 + $0x6c] ss:$16 sps:$4 sm:$0xff]   ;;  %v4431_v54 = vld [vmem:[#allocation8 + $0x60] ss:$16 sps:$4 sm:$0xff]  }
 0x131   :  { %1638 = vmatpush1.bf16.msra.mxu0 %v4337_v55  ;;  %1810 = vmatpush1.bf16.msra.mxu1 %v4340_v56  ;;  %v4434_v55 = vld [vmem:[#allocation8 + $0x68] ss:$16 sps:$4 sm:$0xff]   ;;  %v4439_v56 = vld [vmem:[#allocation8 + $0x84] ss:$16 sps:$4 sm:$0xff]  }
 0x132   :  { %1639 = vmatprep.subr.bf16.mxu0 %v4345_v57  ;;  %1811 = vmatprep.subr.bf16.mxu1 %v4348_v58  ;;  %v4442_v57 = vld [vmem:[#allocation8 + $0x8c] ss:$16 sps:$4 sm:$0xff]   ;;  %v4437_v58 = vld [vmem:[#allocation8 + $0x80] ss:$16 sps:$4 sm:$0xff]  }
 0x135   :  { %1640 = vmatpush1.bf16.msra.mxu0 %v4343_v59  ;;  %1812 = vmatpush1.bf16.msra.mxu1 %v4346_v60  ;;  %v4440_v59 = vld [vmem:[#allocation8 + $0x88] ss:$16 sps:$4 sm:$0xff]   ;;  %v4445_v60 = vld [vmem:[#allocation8 + $0xa4] ss:$16 sps:$4 sm:$0xff]  }
 0x136   :  { %1641 = vmatprep.subr.bf16.mxu0 %v4351_v61  ;;  %1813 = vmatprep.subr.bf16.mxu1 %v4354_v62  ;;  %v4448_v61 = vld [vmem:[#allocation8 + $0xac] ss:$16 sps:$4 sm:$0xff]   ;;  %v4443_v62 = vld [vmem:[#allocation8 + $0xa0] ss:$16 sps:$4 sm:$0xff]  }
 0x139   :  { %1642 = vmatpush1.bf16.msra.mxu0 %v4349_v63  ;;  %1814 = vmatpush1.bf16.msra.mxu1 %v4352_v0  ;;  %v4446_v63 = vld [vmem:[#allocation8 + $0xa8] ss:$16 sps:$4 sm:$0xff]   ;;  %v4451_v0 = vld [vmem:[#allocation8 + $0xc4] ss:$16 sps:$4 sm:$0xff]  }
 0x13a   :  { %1643 = vmatprep.subr.bf16.mxu0 %v4357_v1  ;;  %1815 = vmatprep.subr.bf16.mxu1 %v4360_v2  ;;  %v4454_v1 = vld [vmem:[#allocation8 + $0xcc] ss:$16 sps:$4 sm:$0xff]   ;;  %v4449_v2 = vld [vmem:[#allocation8 + $0xc0] ss:$16 sps:$4 sm:$0xff]  }
 0x13d   :  { %1644 = vmatpush1.bf16.msra.mxu0 %v4355_v3  ;;  %1816 = vmatpush1.bf16.msra.mxu1 %v4358_v4  ;;  %v4452_v3 = vld [vmem:[#allocation8 + $0xc8] ss:$16 sps:$4 sm:$0xff]   ;;  %v4457_v4 = vld [vmem:[#allocation8 + $0xe4] ss:$16 sps:$4 sm:$0xff]  }
 0x13e   :  { %1656 = vmatprep.subr.bf16.mxu0 %v4366_v5  ;;  %1828 = vmatprep.subr.bf16.mxu1 %v4369_v7  ;;  %v4460_v5 = vld [vmem:[#allocation8 + $0xec] ss:$16 sps:$4 sm:$0xff]   ;;  %v4458_v7 = vld [vmem:[#allocation8 + $0xe8] ss:$16 sps:$4 sm:$0xff]  }
 0x140   :  { %1646 = vmatmul.mubr.bf16.vlgmr.msra.gmra.mrb[0].mxu0 %v4361_v6  ;;  %1818 = vmatmul.mubr.bf16.vlgmr.msra.gmra.mrb[0].mxu1 %v4361_v6  ;;  %v4455_v6 = vld [vmem:[#allocation8 + $0xe0] ss:$16 sps:$4 sm:$0xff]  }
 0x141   :  { %1657 = vmatpush1.bf16.msra.mxu0 %v4364_v8  ;;  %1829 = vmatpush1.bf16.msra.mxu1 %v4367_v9  ;;  %v4463_v8 = vld [vmem:[#allocation8 + $0x104] ss:$16 sps:$4 sm:$0xff]   ;;  %v4466_v9 = vld [vmem:[#allocation8 + $0x10c] ss:$16 sps:$4 sm:$0xff]  }
 0x142   :  { %1658 = vmatprep.subr.bf16.mxu0 %v4372_v10  ;;  %1830 = vmatprep.subr.bf16.mxu1 %v4375_v11  ;;  %v4461_v10 = vld [vmem:[#allocation8 + $0x100] ss:$16 sps:$4 sm:$0xff]   ;;  %v4464_v11 = vld [vmem:[#allocation8 + $0x108] ss:$16 sps:$4 sm:$0xff]  }
 0x143   :  { %1688 = vmatprep.mubr.bf16.mxu0 %v4868_v18  ;;  %1860 = vmatprep.mubr.bf16.mxu1 %v4868_v18  ;;  %v4473_v18 = vld [vmem:[#allocation8 + $0x140] ss:$16 sps:$4 sm:$0xff]  }
 0x145   :  { %1659 = vmatpush1.bf16.msra.mxu0 %v4370_v12  ;;  %1831 = vmatpush1.bf16.msra.mxu1 %v4373_v13  ;;  %v4469_v12 = vld [vmem:[#allocation8 + $0x124] ss:$16 sps:$4 sm:$0xff]   ;;  %v4472_v13 = vld [vmem:[#allocation8 + $0x12c] ss:$16 sps:$4 sm:$0xff]  }
 0x146   :  { %1660 = vmatprep.subr.bf16.mxu0 %v4378_v14  ;;  %1832 = vmatprep.subr.bf16.mxu1 %v4381_v15  ;;  %v4467_v14 = vld [vmem:[#allocation8 + $0x120] ss:$16 sps:$4 sm:$0xff]   ;;  %v4470_v15 = vld [vmem:[#allocation8 + $0x128] ss:$16 sps:$4 sm:$0xff]  }
 0x149   :  { %1661 = vmatpush1.bf16.msra.mxu0 %v4376_v16  ;;  %1833 = vmatpush1.bf16.msra.mxu1 %v4379_v17  ;;  %v4475_v16 = vld [vmem:[#allocation8 + $0x144] ss:$16 sps:$4 sm:$0xff]   ;;  %v4478_v17 = vld [vmem:[#allocation8 + $0x14c] ss:$16 sps:$4 sm:$0xff]  }
 0x14a   :  { %1662 = vmatprep.subr.bf16.mxu0 %v4384_v19  ;;  %1834 = vmatprep.subr.bf16.mxu1 %v4387_v20  ;;  %v4476_v19 = vld [vmem:[#allocation8 + $0x148] ss:$16 sps:$4 sm:$0xff]   ;;  %v4481_v20 = vld [vmem:[#allocation8 + $0x164] ss:$16 sps:$4 sm:$0xff]  }
 0x14d   :  { %1663 = vmatpush1.bf16.msra.mxu0 %v4382_v21  ;;  %1835 = vmatpush1.bf16.msra.mxu1 %v4385_v22  ;;  %v4484_v21 = vld [vmem:[#allocation8 + $0x16c] ss:$16 sps:$4 sm:$0xff]   ;;  %v4479_v22 = vld [vmem:[#allocation8 + $0x160] ss:$16 sps:$4 sm:$0xff]  }
 0x14e   :  { %1664 = vmatprep.subr.bf16.mxu0 %v4390_v23  ;;  %1836 = vmatprep.subr.bf16.mxu1 %v4393_v24  ;;  %v4482_v23 = vld [vmem:[#allocation8 + $0x168] ss:$16 sps:$4 sm:$0xff]   ;;  %v4487_v24 = vld [vmem:[#allocation8 + $0x184] ss:$16 sps:$4 sm:$0xff]  }
 0x151   :  { %1665 = vmatpush1.bf16.msra.mxu0 %v4388_v25  ;;  %1837 = vmatpush1.bf16.msra.mxu1 %v4391_v26  ;;  %v4490_v25 = vld [vmem:[#allocation8 + $0x18c] ss:$16 sps:$4 sm:$0xff]   ;;  %v4485_v26 = vld [vmem:[#allocation8 + $0x180] ss:$16 sps:$4 sm:$0xff]  }
 0x152   :  { %1666 = vmatprep.subr.bf16.mxu0 %v4396_v27  ;;  %1838 = vmatprep.subr.bf16.mxu1 %v4399_v28  ;;  %v4488_v27 = vld [vmem:[#allocation8 + $0x188] ss:$16 sps:$4 sm:$0xff]   ;;  %v4493_v28 = vld [vmem:[#allocation8 + $0x1a4] ss:$16 sps:$4 sm:$0xff]  }
 0x155   :  { %1667 = vmatpush1.bf16.msra.mxu0 %v4394_v29  ;;  %1839 = vmatpush1.bf16.msra.mxu1 %v4397_v30  ;;  %v4496_v29 = vld [vmem:[#allocation8 + $0x1ac] ss:$16 sps:$4 sm:$0xff]   ;;  %v4491_v30 = vld [vmem:[#allocation8 + $0x1a0] ss:$16 sps:$4 sm:$0xff]  }
 0x156   :  { %1668 = vmatprep.subr.bf16.mxu0 %v4402_v31  ;;  %1840 = vmatprep.subr.bf16.mxu1 %v4405_v32  ;;  %v4494_v31 = vld [vmem:[#allocation8 + $0x1a8] ss:$16 sps:$4 sm:$0xff]   ;;  %v4499_v32 = vld [vmem:[#allocation8 + $0x1c4] ss:$16 sps:$4 sm:$0xff]  }
 0x159   :  { %1669 = vmatpush1.bf16.msra.mxu0 %v4400_v33  ;;  %1841 = vmatpush1.bf16.msra.mxu1 %v4403_v34  ;;  %v4502_v33 = vld [vmem:[#allocation8 + $0x1cc] ss:$16 sps:$4 sm:$0xff]   ;;  %v4497_v34 = vld [vmem:[#allocation8 + $0x1c0] ss:$16 sps:$4 sm:$0xff]  }
 0x15a   :  { %1670 = vmatprep.subr.bf16.mxu0 %v4408_v35  ;;  %1842 = vmatprep.subr.bf16.mxu1 %v4411_v36  ;;  %v4500_v35 = vld [vmem:[#allocation8 + $0x1c8] ss:$16 sps:$4 sm:$0xff]   ;;  %v4505_v36 = vld [vmem:[#allocation8 + $0x1e4] ss:$16 sps:$4 sm:$0xff]  }
 0x15d   :  { %1671 = vmatpush1.bf16.msra.mxu0 %v4406_v37  ;;  %1843 = vmatpush1.bf16.msra.mxu1 %v4409_v38  ;;  %v4508_v37 = vld [vmem:[#allocation8 + $0x1ec] ss:$16 sps:$4 sm:$0xff]   ;;  %v4503_v38 = vld [vmem:[#allocation8 + $0x1e0] ss:$16 sps:$4 sm:$0xff]  }
 0x15e   :  { %2673 = vmatprep.subr.bf16.mxu0 %v4415_v39  ;;  %2759 = vmatprep.subr.bf16.mxu1 %v4418_v40  ;;  %v4506_v39 = vld [vmem:[#allocation8 + $0x1e8] ss:$16 sps:$4 sm:$0xff]   ;;  %v4511_v40 = vld [vmem:[#allocation8 + $0x204] ss:$16 sps:$4 sm:$0xff]  }
 0x160   :  { %1689 = vmatmul.mubr.bf16.vlgmr.msra.gmra.mrb[0].mxu0 %v4412_v41  ;;  %1861 = vmatmul.mubr.bf16.vlgmr.msra.gmra.mrb[0].mxu1 %v4412_v41  ;;  %v4514_v41 = vld [vmem:[#allocation8 + $0x20c] ss:$16 sps:$4 sm:$0xff]  }
 0x161   :  { %2674 = vmatpush1.bf16.msra.mxu0 %v4413_v42  ;;  %2760 = vmatpush1.bf16.msra.mxu1 %v4416_v43  ;;  %v351_v42 = vlaneseq }
 0x162   :  { %2675 = vmatprep.subr.bf16.mxu0 %v4421_v44  ;;  %2761 = vmatprep.subr.bf16.mxu1 %v4424_v45 }
 0x163   :  { %v4998_v43 = vshrl.u32 %v351_v42, 7  ;;  %v4548_v42 = vld [vmem:[#allocation8 + $0x2c8] ss:$16 sps:$4 sm:$0xff]  }
 0x165   :  { %2676 = vmatpush1.bf16.msra.mxu0 %v4419_v46  ;;  %2762 = vmatpush1.bf16.msra.mxu1 %v4422_v47  ;;  %v353_v44 = vsub.s32 0, %v4998_v43  ;;  %v361_v45 = vsub.s32 2, %v4998_v43  ;;  %v349_v46 = vld [vmem:[#allocation7] sm:$0xf]  ;;  %v357_v47 = vsub.s32 1, %v4998_v43 }
 0x166   :  { %2677 = vmatprep.subr.bf16.mxu0 %v4427_v48  ;;  %2763 = vmatprep.subr.bf16.mxu1 %v4430_v49  ;;  %v365_v48 = vsub.s32 3, %v4998_v43 }
 0x167   :  { %v354_v49 = vrot.slane %v349_v46, %v353_v44 }
 0x169   :  { %2678 = vmatpush1.bf16.msra.mxu0 %v4425_v50  ;;  %2764 = vmatpush1.bf16.msra.mxu1 %v4428_v51  ;;  %v362_v50 = vrot.slane %v349_v46, %v361_v45  ;;  %v358_v51 = vrot.slane %v349_v46, %v357_v47 }
 0x16a   :  { %2679 = vmatprep.subr.bf16.mxu0 %v4433_v52  ;;  %2765 = vmatprep.subr.bf16.mxu1 %v4436_v53  ;;  %v366_v52 = vrot.slane %v349_v46, %v365_v48  ;;  %v4553_v46 = vld [vmem:[#allocation8 + $0x2e4] ss:$16 sps:$4 sm:$0xff]  }
 0x16d   :  { %2680 = vmatpush1.bf16.msra.mxu0 %v4431_v54  ;;  %2766 = vmatpush1.bf16.msra.mxu1 %v4434_v55 }
 0x16e   :  { %2681 = vmatprep.subr.bf16.mxu0 %v4439_v56  ;;  %2767 = vmatprep.subr.bf16.mxu1 %v4442_v57 }
 0x171   :  { %2682 = vmatpush1.bf16.msra.mxu0 %v4437_v58  ;;  %2768 = vmatpush1.bf16.msra.mxu1 %v4440_v59 }
 0x172   :  { %2683 = vmatprep.subr.bf16.mxu0 %v4445_v60  ;;  %2769 = vmatprep.subr.bf16.mxu1 %v4448_v61 }
 0x175   :  { %2684 = vmatpush1.bf16.msra.mxu0 %v4443_v62  ;;  %2770 = vmatpush1.bf16.msra.mxu1 %v4446_v63 }
 0x176   :  { %2685 = vmatprep.subr.bf16.mxu0 %v4451_v0  ;;  %2771 = vmatprep.subr.bf16.mxu1 %v4454_v1 }
 0x179   :  { %2686 = vmatpush1.bf16.msra.mxu0 %v4449_v2  ;;  %2772 = vmatpush1.bf16.msra.mxu1 %v4452_v3 }
 0x17a   :  { %2687 = vmatprep.subr.bf16.mxu0 %v4457_v4  ;;  %2773 = vmatprep.subr.bf16.mxu1 %v4460_v5 }
 0x17d   :  { %2688 = vmatpush1.bf16.msra.mxu0 %v4455_v6  ;;  %2774 = vmatpush1.bf16.msra.mxu1 %v4458_v7 }
 0x17e   :  { %2689 = vmatprep.subr.bf16.mxu0 %v4463_v8  ;;  %2775 = vmatprep.subr.bf16.mxu1 %v4466_v9 }
 0x181   :  { %2690 = vmatpush1.bf16.msra.mxu0 %v4461_v10  ;;  %2776 = vmatpush1.bf16.msra.mxu1 %v4464_v11 }
 0x182   :  { %2691 = vmatprep.subr.bf16.mxu0 %v4469_v12  ;;  %2777 = vmatprep.subr.bf16.mxu1 %v4472_v13 }
 0x185   :  { %2692 = vmatpush1.bf16.msra.mxu0 %v4467_v14  ;;  %2778 = vmatpush1.bf16.msra.mxu1 %v4470_v15 }
 0x186   :  { %2693 = vmatprep.subr.bf16.mxu0 %v4475_v16  ;;  %2779 = vmatprep.subr.bf16.mxu1 %v4478_v17  ;;  %v4509_v17 = vld [vmem:[#allocation8 + $0x200] ss:$16 sps:$4 sm:$0xff]  }
 0x189   :  { %2694 = vmatpush1.bf16.msra.mxu0 %v4473_v18  ;;  %2780 = vmatpush1.bf16.msra.mxu1 %v4476_v19  ;;  %v4512_v18 = vld [vmem:[#allocation8 + $0x208] ss:$16 sps:$4 sm:$0xff]   ;;  %v4517_v19 = vld [vmem:[#allocation8 + $0x224] ss:$16 sps:$4 sm:$0xff]  }
 0x18a   :  { %2695 = vmatprep.subr.bf16.mxu0 %v4481_v20  ;;  %2781 = vmatprep.subr.bf16.mxu1 %v4484_v21  ;;  %v4520_v20 = vld [vmem:[#allocation8 + $0x22c] ss:$16 sps:$4 sm:$0xff]   ;;  %v4515_v21 = vld [vmem:[#allocation8 + $0x220] ss:$16 sps:$4 sm:$0xff]  }
 0x18d   :  { %2696 = vmatpush1.bf16.msra.mxu0 %v4479_v22  ;;  %2782 = vmatpush1.bf16.msra.mxu1 %v4482_v23  ;;  %v4518_v22 = vld [vmem:[#allocation8 + $0x228] ss:$16 sps:$4 sm:$0xff]   ;;  %v4523_v23 = vld [vmem:[#allocation8 + $0x244] ss:$16 sps:$4 sm:$0xff]  }
 0x18e   :  { %2697 = vmatprep.subr.bf16.mxu0 %v4487_v24  ;;  %2783 = vmatprep.subr.bf16.mxu1 %v4490_v25  ;;  %v4526_v24 = vld [vmem:[#allocation8 + $0x24c] ss:$16 sps:$4 sm:$0xff]   ;;  %v4521_v25 = vld [vmem:[#allocation8 + $0x240] ss:$16 sps:$4 sm:$0xff]  }
 0x191   :  { %2698 = vmatpush1.bf16.msra.mxu0 %v4485_v26  ;;  %2784 = vmatpush1.bf16.msra.mxu1 %v4488_v27  ;;  %v4524_v26 = vld [vmem:[#allocation8 + $0x248] ss:$16 sps:$4 sm:$0xff]   ;;  %v4529_v27 = vld [vmem:[#allocation8 + $0x264] ss:$16 sps:$4 sm:$0xff]  }
 0x192   :  { %2699 = vmatprep.subr.bf16.mxu0 %v4493_v28  ;;  %2785 = vmatprep.subr.bf16.mxu1 %v4496_v29  ;;  %v4532_v28 = vld [vmem:[#allocation8 + $0x26c] ss:$16 sps:$4 sm:$0xff]   ;;  %v4527_v29 = vld [vmem:[#allocation8 + $0x260] ss:$16 sps:$4 sm:$0xff]  }
 0x195   :  { %2700 = vmatpush1.bf16.msra.mxu0 %v4491_v30  ;;  %2786 = vmatpush1.bf16.msra.mxu1 %v4494_v31  ;;  %v4530_v30 = vld [vmem:[#allocation8 + $0x268] ss:$16 sps:$4 sm:$0xff]   ;;  %v4535_v31 = vld [vmem:[#allocation8 + $0x284] ss:$16 sps:$4 sm:$0xff]  }
 0x196   :  { %2701 = vmatprep.subr.bf16.mxu0 %v4499_v32  ;;  %2787 = vmatprep.subr.bf16.mxu1 %v4502_v33  ;;  %v4538_v32 = vld [vmem:[#allocation8 + $0x28c] ss:$16 sps:$4 sm:$0xff]   ;;  %v4533_v33 = vld [vmem:[#allocation8 + $0x280] ss:$16 sps:$4 sm:$0xff]  }
 0x199   :  { %2702 = vmatpush1.bf16.msra.mxu0 %v4497_v34  ;;  %2788 = vmatpush1.bf16.msra.mxu1 %v4500_v35  ;;  %v4536_v34 = vld [vmem:[#allocation8 + $0x288] ss:$16 sps:$4 sm:$0xff]   ;;  %v4541_v35 = vld [vmem:[#allocation8 + $0x2a4] ss:$16 sps:$4 sm:$0xff]  }
 0x19a   :  { %2703 = vmatprep.subr.bf16.mxu0 %v4505_v36  ;;  %2789 = vmatprep.subr.bf16.mxu1 %v4508_v37  ;;  %v4544_v36 = vld [vmem:[#allocation8 + $0x2ac] ss:$16 sps:$4 sm:$0xff]   ;;  %v4539_v37 = vld [vmem:[#allocation8 + $0x2a0] ss:$16 sps:$4 sm:$0xff]  }
 0x19d   :  { %2704 = vmatpush1.bf16.msra.mxu0 %v4503_v38  ;;  %2790 = vmatpush1.bf16.msra.mxu1 %v4506_v39  ;;  %v4542_v38 = vld [vmem:[#allocation8 + $0x2a8] ss:$16 sps:$4 sm:$0xff]   ;;  %v4547_v39 = vld [vmem:[#allocation8 + $0x2c4] ss:$16 sps:$4 sm:$0xff]  }
 0x19e   :  { %2716 = vmatprep.subr.bf16.mxu0 %v4511_v40  ;;  %2802 = vmatprep.subr.bf16.mxu1 %v4514_v41  ;;  %v4550_v40 = vld [vmem:[#allocation8 + $0x2cc] ss:$16 sps:$4 sm:$0xff]   ;;  %v4545_v41 = vld [vmem:[#allocation8 + $0x2c0] ss:$16 sps:$4 sm:$0xff]  }
 0x233   :  { %v1690_v53 = vpop.f32.mrb[0].mxu0  ;;  %v1862_v54 = vpop.f32.mrb[0].mxu1 }
 0x234   :  { %v4003_v55 = vadd.f32 %v1690_v53, %v354_v49  ;;  %v4007_v56 = vadd.f32 %v1862_v54, %v362_v50  ;;  %v1692_v57 = vpop.f32.mrb[1].mxu0  ;;  %v1864_v58 = vpop.f32.mrb[1].mxu1  ;;  %v4562_v53 = vld [vmem:[#allocation8 + $0x30c] ss:$16 sps:$4 sm:$0xff]   ;;  %v4557_v54 = vld [vmem:[#allocation8 + $0x300] ss:$16 sps:$4 sm:$0xff]  }
 0x235   :  { %v4004_v59 = vadd.f32 %v1692_v57, %v358_v51  ;;  %v4008_v60 = vadd.f32 %v1864_v58, %v366_v52  ;;  %v1694_v61 = vpop.f32.mrb[2].mxu0  ;;  %v1866_v62 = vpop.f32.mrb[2].mxu1  ;;  %v4568_v57 = vld [vmem:[#allocation8 + $0x32c] ss:$16 sps:$4 sm:$0xff]   ;;  %v4563_v58 = vld [vmem:[#allocation8 + $0x320] ss:$16 sps:$4 sm:$0xff]  }
 0x236   :  { %v4005_v63 = vadd.f32 %v1694_v61, %v354_v49  ;;  %v4009_v0 = vadd.f32 %v1866_v62, %v362_v50  ;;  %v1696_v1 = vpop.f32.mrb[3].mxu0  ;;  %v1868_v2 = vpop.f32.mrb[3].mxu1  ;;  %v1871_v5 = vmax.f32 %v4003_v55, 0.0  ;;  %v1873_v6 = vmax.f32 %v4007_v56, 0.0  ;;  %v4556_v49 = vld [vmem:[#allocation8 + $0x2ec] ss:$16 sps:$4 sm:$0xff]  }
 0x237   :  { %v4006_v3 = vadd.f32 %v1696_v1, %v358_v51  ;;  %v4010_v4 = vadd.f32 %v1868_v2, %v366_v52  ;;  %v1872_v9 = vmax.f32 %v4004_v59, 0.0  ;;  %v1874_v10 = vmax.f32 %v4008_v60, 0.0  ;;  %v4551_v50 = vld [vmem:[#allocation8 + $0x2e0] ss:$16 sps:$4 sm:$0xff]   ;;  %v4554_v51 = vld [vmem:[#allocation8 + $0x2e8] ss:$16 sps:$4 sm:$0xff]  }
 0x238   :  { %v1875_v7 = vmax.f32 %v4005_v63, 0.0  ;;  %v1877_v8 = vmax.f32 %v4009_v0, 0.0  ;;  %v4559_v52 = vld [vmem:[#allocation8 + $0x304] ss:$16 sps:$4 sm:$0xff]   ;;  %v4560_v55 = vld [vmem:[#allocation8 + $0x308] ss:$16 sps:$4 sm:$0xff]  }
 0x239   :  { %v1876_v11 = vmax.f32 %v4006_v3, 0.0  ;;  %v1878_v12 = vmax.f32 %v4010_v4, 0.0  ;;  %v4565_v56 = vld [vmem:[#allocation8 + $0x324] ss:$16 sps:$4 sm:$0xff]   ;;  %v4566_v59 = vld [vmem:[#allocation8 + $0x328] ss:$16 sps:$4 sm:$0xff]  }
 0x23a   :  { %v1879_v13 = vpack.c.bf16 %v1875_v7, %v1871_v5  ;;  %v5012_v14 = vpack.c.bf16 %v1877_v8, %v1873_v6  ;;  %v4571_v60 = vld [vmem:[#allocation8 + $0x344] ss:$16 sps:$4 sm:$0xff]   ;;  %v4574_v61 = vld [vmem:[#allocation8 + $0x34c] ss:$16 sps:$4 sm:$0xff]   ;;  %v4569_v62 = vld [vmem:[#allocation8 + $0x340] ss:$16 sps:$4 sm:$0xff]  }
 0x23b   :  { %v1880_v15 = vpack.c.bf16 %v1876_v11, %v1872_v9  ;;  %v1882_v16 = vpack.c.bf16 %v1878_v12, %v1874_v10  ;;  %v4572_v63 = vld [vmem:[#allocation8 + $0x348] ss:$16 sps:$4 sm:$0xff]   ;;  %v4577_v0 = vld [vmem:[#allocation8 + $0x364] ss:$16 sps:$4 sm:$0xff]   ;;  %v4580_v1 = vld [vmem:[#allocation8 + $0x36c] ss:$16 sps:$4 sm:$0xff]  }
 0x23c   :  { %v4575_v2 = vld [vmem:[#allocation8 + $0x360] ss:$16 sps:$4 sm:$0xff]   ;;  %v4578_v3 = vld [vmem:[#allocation8 + $0x368] ss:$16 sps:$4 sm:$0xff]   ;;  %v4583_v4 = vld [vmem:[#allocation8 + $0x384] ss:$16 sps:$4 sm:$0xff]  }
 0x23d   :  { %2705 = vmatprep.mubr.bf16.mxu0 %v1880_v15  ;;  %2791 = vmatprep.mubr.bf16.mxu1 %v1880_v15  ;;  %v4586_v5 = vld [vmem:[#allocation8 + $0x38c] ss:$16 sps:$4 sm:$0xff]   ;;  %v4581_v6 = vld [vmem:[#allocation8 + $0x380] ss:$16 sps:$4 sm:$0xff]   ;;  %v4584_v7 = vld [vmem:[#allocation8 + $0x388] ss:$16 sps:$4 sm:$0xff]  }
 0x23e   :  { %2706 = vmatmul.mubr.bf16.vlgmr.msra.gmra.mrb[4].mxu0 %v1879_v13  ;;  %2792 = vmatmul.mubr.bf16.vlgmr.msra.gmra.mrb[4].mxu1 %v1879_v13  ;;  %v4589_v8 = vld [vmem:[#allocation8 + $0x3a4] ss:$16 sps:$4 sm:$0xff]   ;;  %v4592_v9 = vld [vmem:[#allocation8 + $0x3ac] ss:$16 sps:$4 sm:$0xff]   ;;  %v4587_v10 = vld [vmem:[#allocation8 + $0x3a0] ss:$16 sps:$4 sm:$0xff]  }
 0x23f   :  { %2717 = vmatpush1.bf16.msra.mxu0 %v4509_v17  ;;  %2803 = vmatpush1.bf16.msra.mxu1 %v4512_v18  ;;  %v4590_v11 = vld [vmem:[#allocation8 + $0x3a8] ss:$16 sps:$4 sm:$0xff]   ;;  %v4595_v12 = vld [vmem:[#allocation8 + $0x3c4] ss:$16 sps:$4 sm:$0xff]   ;;  %v4598_v13 = vld [vmem:[#allocation8 + $0x3cc] ss:$16 sps:$4 sm:$0xff]  }
 0x240   :  { %2748 = vmatprep.mubr.bf16.mxu0 %v1882_v16  ;;  %2834 = vmatprep.mubr.bf16.mxu1 %v1882_v16  ;;  %v4593_v15 = vld [vmem:[#allocation8 + $0x3c0] ss:$16 sps:$4 sm:$0xff]   ;;  %v4596_v16 = vld [vmem:[#allocation8 + $0x3c8] ss:$16 sps:$4 sm:$0xff]   ;;  %v4601_v17 = vld [vmem:[#allocation8 + $0x3e4] ss:$16 sps:$4 sm:$0xff]  }
 0x241   :  { %2718 = vmatprep.subr.bf16.mxu0 %v4517_v19  ;;  %2804 = vmatprep.subr.bf16.mxu1 %v4520_v20  ;;  %v4604_v18 = vld [vmem:[#allocation8 + $0x3ec] ss:$16 sps:$4 sm:$0xff]   ;;  %v4599_v19 = vld [vmem:[#allocation8 + $0x3e0] ss:$16 sps:$4 sm:$0xff]   ;;  %v4602_v20 = vld [vmem:[#allocation8 + $0x3e8] ss:$16 sps:$4 sm:$0xff]  }
 0x243   :  { %2719 = vmatpush1.bf16.msra.mxu0 %v4515_v21  ;;  %2805 = vmatpush1.bf16.msra.mxu1 %v4518_v22  ;;  %v4605_v21 = vld [vmem:[#allocation11 + $0x40] sm:$0xff]  }
 0x244   :  { %2720 = vmatprep.subr.bf16.mxu0 %v4523_v23  ;;  %2806 = vmatprep.subr.bf16.mxu1 %v4526_v24  ;;  %v4606_v22 = vld [vmem:[#allocation11 + $0xc0] sm:$0xff]  }
 0x245   :  { %v4607_v23 = vld [vmem:[#allocation11] sm:$0xff]  }
 0x246   :  { %v4608_v24 = vld [vmem:[#allocation11 + $0x80] sm:$0xff]  }
 0x247   :  { %2721 = vmatpush1.bf16.msra.mxu0 %v4521_v25  ;;  %2807 = vmatpush1.bf16.msra.mxu1 %v4524_v26  ;;  %v4609_v25 = vld [vmem:[#allocation11 + $0x48] sm:$0xff]  }
 0x248   :  { %2722 = vmatprep.subr.bf16.mxu0 %v4529_v27  ;;  %2808 = vmatprep.subr.bf16.mxu1 %v4532_v28  ;;  %v4610_v26 = vld [vmem:[#allocation11 + $0xc8] sm:$0xff]  }
 0x249   :  { %v4611_v27 = vld [vmem:[#allocation11 + $0x8] sm:$0xff]  }
 0x24a   :  { %v4612_v28 = vld [vmem:[#allocation11 + $0x88] sm:$0xff]  }
 0x24b   :  { %2723 = vmatpush1.bf16.msra.mxu0 %v4527_v29  ;;  %2809 = vmatpush1.bf16.msra.mxu1 %v4530_v30  ;;  %v4613_v29 = vld [vmem:[#allocation11 + $0x50] sm:$0xff]  }
 0x24c   :  { %2724 = vmatprep.subr.bf16.mxu0 %v4535_v31  ;;  %2810 = vmatprep.subr.bf16.mxu1 %v4538_v32  ;;  %v4614_v30 = vld [vmem:[#allocation11 + $0xd0] sm:$0xff]   ;;  %v4617_v32 = vld [vmem:[#allocation11 + $0x58] sm:$0xff]  }
 0x24d   :  { %v4615_v31 = vld [vmem:[#allocation11 + $0x10] sm:$0xff]  }
 0x24f   :  { %2725 = vmatpush1.bf16.msra.mxu0 %v4533_v33  ;;  %2811 = vmatpush1.bf16.msra.mxu1 %v4536_v34  ;;  %v4618_v33 = vld [vmem:[#allocation11 + $0xd8] sm:$0xff]  }
 0x250   :  { %2726 = vmatprep.subr.bf16.mxu0 %v4541_v35  ;;  %2812 = vmatprep.subr.bf16.mxu1 %v4544_v36  ;;  %v4619_v34 = vld [vmem:[#allocation11 + $0x18] sm:$0xff]   ;;  %v4621_v36 = vld [vmem:[#allocation11 + $0x60] sm:$0xff]  }
 0x251   :  { %v4620_v35 = vld [vmem:[#allocation11 + $0x98] sm:$0xff]  }
 0x253   :  { %2727 = vmatpush1.bf16.msra.mxu0 %v4539_v37  ;;  %2813 = vmatpush1.bf16.msra.mxu1 %v4542_v38  ;;  %v4622_v37 = vld [vmem:[#allocation11 + $0xe0] sm:$0xff]  }
 0x254   :  { %2728 = vmatprep.subr.bf16.mxu0 %v4547_v39  ;;  %2814 = vmatprep.subr.bf16.mxu1 %v4550_v40  ;;  %v4623_v38 = vld [vmem:[#allocation11 + $0x20] sm:$0xff]   ;;  %v4625_v40 = vld [vmem:[#allocation11 + $0x68] sm:$0xff]  }
 0x255   :  { %v4624_v39 = vld [vmem:[#allocation11 + $0xa0] sm:$0xff]  }
 0x257   :  { %2729 = vmatpush1.bf16.msra.mxu0 %v4545_v41  ;;  %2815 = vmatpush1.bf16.msra.mxu1 %v4548_v42  ;;  %v4626_v41 = vld [vmem:[#allocation11 + $0xe8] sm:$0xff]  }
 0x258   :  { %2730 = vmatprep.subr.bf16.mxu0 %v4553_v46  ;;  %2816 = vmatprep.subr.bf16.mxu1 %v4556_v49  ;;  %v4627_v42 = vld [vmem:[#allocation11 + $0x28] sm:$0xff]   ;;  %v4629_v49 = vld [vmem:[#allocation11 + $0x70] sm:$0xff]  }
 0x259   :  { %v4628_v46 = vld [vmem:[#allocation11 + $0xa8] sm:$0xff]  }
 0x25b   :  { %2731 = vmatpush1.bf16.msra.mxu0 %v4551_v50  ;;  %2817 = vmatpush1.bf16.msra.mxu1 %v4554_v51  ;;  %v4630_v50 = vld [vmem:[#allocation11 + $0xf0] sm:$0xff]  }
 0x25c   :  { %2732 = vmatprep.subr.bf16.mxu0 %v4559_v52  ;;  %2818 = vmatprep.subr.bf16.mxu1 %v4562_v53  ;;  %v4631_v51 = vld [vmem:[#allocation11 + $0x30] sm:$0xff]   ;;  %v4633_v53 = vld [vmem:[#allocation11 + $0x78] sm:$0xff]  }
 0x25d   :  { %v4632_v52 = vld [vmem:[#allocation11 + $0xb0] sm:$0xff]  }
 0x25f   :  { %2733 = vmatpush1.bf16.msra.mxu0 %v4557_v54  ;;  %2819 = vmatpush1.bf16.msra.mxu1 %v4560_v55  ;;  %v4634_v54 = vld [vmem:[#allocation11 + $0xf8] sm:$0xff]  }
 0x260   :  { %2734 = vmatprep.subr.bf16.mxu0 %v4565_v56  ;;  %2820 = vmatprep.subr.bf16.mxu1 %v4568_v57  ;;  %v4635_v55 = vld [vmem:[#allocation11 + $0x38] sm:$0xff]  }
 0x261   :  { %v4636_v56 = vld [vmem:[#allocation11 + $0xb8] sm:$0xff]  }
 0x262   :  { %v2011_v57 = vld [vmem:[#allocation10] sm:$0xf] }
 0x263   :  { %2735 = vmatpush1.bf16.msra.mxu0 %v4563_v58  ;;  %2821 = vmatpush1.bf16.msra.mxu1 %v4566_v59  ;;  %v2016_v58 = vrot.slane %v2011_v57, %v353_v44  ;;  %v2024_v59 = vrot.slane %v2011_v57, %v361_v45 }
 0x264   :  { %2736 = vmatprep.subr.bf16.mxu0 %v4571_v60  ;;  %2822 = vmatprep.subr.bf16.mxu1 %v4574_v61  ;;  %v2020_v60 = vrot.slane %v2011_v57, %v357_v47  ;;  %v2028_v61 = vrot.slane %v2011_v57, %v365_v48 }
 0x267   :  { %2737 = vmatpush1.bf16.msra.mxu0 %v4569_v62  ;;  %2823 = vmatpush1.bf16.msra.mxu1 %v4572_v63 }
 0x268   :  { %2738 = vmatprep.subr.bf16.mxu0 %v4577_v0  ;;  %2824 = vmatprep.subr.bf16.mxu1 %v4580_v1 }
 0x26b   :  { %2739 = vmatpush1.bf16.msra.mxu0 %v4575_v2  ;;  %2825 = vmatpush1.bf16.msra.mxu1 %v4578_v3 }
 0x26c   :  { %2740 = vmatprep.subr.bf16.mxu0 %v4583_v4  ;;  %2826 = vmatprep.subr.bf16.mxu1 %v4586_v5 }
 0x26f   :  { %2741 = vmatpush1.bf16.msra.mxu0 %v4581_v6  ;;  %2827 = vmatpush1.bf16.msra.mxu1 %v4584_v7 }
 0x270   :  { %2742 = vmatprep.subr.bf16.mxu0 %v4589_v8  ;;  %2828 = vmatprep.subr.bf16.mxu1 %v4592_v9 }
 0x273   :  { %2743 = vmatpush1.bf16.msra.mxu0 %v4587_v10  ;;  %2829 = vmatpush1.bf16.msra.mxu1 %v4590_v11 }
 0x274   :  { %2744 = vmatprep.subr.bf16.mxu0 %v4595_v12  ;;  %2830 = vmatprep.subr.bf16.mxu1 %v4598_v13 }
 0x277   :  { %2745 = vmatpush1.bf16.msra.mxu0 %v4593_v15  ;;  %2831 = vmatpush1.bf16.msra.mxu1 %v4596_v16 }
 0x278   :  { %2746 = vmatprep.subr.bf16.mxu0 %v4601_v17  ;;  %2832 = vmatprep.subr.bf16.mxu1 %v4604_v18 }
 0x27b   :  { %2747 = vmatpush1.bf16.msra.mxu0 %v4599_v19  ;;  %2833 = vmatpush1.bf16.msra.mxu1 %v4602_v20 }
 0x27c   :  { %3959 = vmatprep.subr.bf16.mxu0 %v4605_v21  ;;  %3981 = vmatprep.subr.bf16.mxu1 %v4606_v22 }
 0x27e   :  { %2749 = vmatmul.mubr.bf16.vlgmr.msra.gmra.mrb[4].mxu0 %v5012_v14  ;;  %2835 = vmatmul.mubr.bf16.vlgmr.msra.gmra.mrb[4].mxu1 %v5012_v14  ;;  %v4616_v14 = vld [vmem:[#allocation11 + $0x90] sm:$0xff]  }
 0x27f   :  { %3960 = vmatpush3.bf16.msra.mxu0 %v4607_v23  ;;  %3982 = vmatpush3.bf16.msra.mxu1 %v4608_v24 }
 0x280   :  { %3961 = vmatprep.subr.bf16.mxu0 %v4609_v25  ;;  %3983 = vmatprep.subr.bf16.mxu1 %v4610_v26 }
 0x283   :  { %3962 = vmatpush3.bf16.msra.mxu0 %v4611_v27  ;;  %3984 = vmatpush3.bf16.msra.mxu1 %v4612_v28 }
 0x284   :  { %3963 = vmatprep.subr.bf16.mxu0 %v4613_v29  ;;  %3985 = vmatprep.subr.bf16.mxu1 %v4614_v30 }
 0x287   :  { %3964 = vmatpush3.bf16.msra.mxu0 %v4615_v31  ;;  %3986 = vmatpush3.bf16.msra.mxu1 %v4616_v14 }
 0x288   :  { %3965 = vmatprep.subr.bf16.mxu0 %v4617_v32  ;;  %3987 = vmatprep.subr.bf16.mxu1 %v4618_v33 }
 0x28b   :  { %3966 = vmatpush3.bf16.msra.mxu0 %v4619_v34  ;;  %3988 = vmatpush3.bf16.msra.mxu1 %v4620_v35 }
 0x28c   :  { %3967 = vmatprep.subr.bf16.mxu0 %v4621_v36  ;;  %3989 = vmatprep.subr.bf16.mxu1 %v4622_v37 }
 0x28f   :  { %3968 = vmatpush3.bf16.msra.mxu0 %v4623_v38  ;;  %3990 = vmatpush3.bf16.msra.mxu1 %v4624_v39 }
 0x290   :  { %3969 = vmatprep.subr.bf16.mxu0 %v4625_v40  ;;  %3991 = vmatprep.subr.bf16.mxu1 %v4626_v41 }
 0x293   :  { %3970 = vmatpush3.bf16.msra.mxu0 %v4627_v42  ;;  %3992 = vmatpush3.bf16.msra.mxu1 %v4628_v46 }
 0x294   :  { %3971 = vmatprep.subr.bf16.mxu0 %v4629_v49  ;;  %3993 = vmatprep.subr.bf16.mxu1 %v4630_v50 }
 0x297   :  { %3972 = vmatpush3.bf16.msra.mxu0 %v4631_v51  ;;  %3994 = vmatpush3.bf16.msra.mxu1 %v4632_v52 }
 0x298   :  { %3973 = vmatprep.subr.bf16.mxu0 %v4633_v53  ;;  %3995 = vmatprep.subr.bf16.mxu1 %v4634_v54 }
 0x29b   :  { %3974 = vmatpush3.bf16.msra.mxu0 %v4635_v55  ;;  %3996 = vmatpush3.bf16.msra.mxu1 %v4636_v56 }
 0x351   :  { %v2750_v62 = vpop.f32.mrb[4].mxu0  ;;  %v2836_v63 = vpop.f32.mrb[4].mxu1 }
 0x352   :  { %v4011_v0 = vadd.f32 %v2750_v62, %v2016_v58  ;;  %v4015_v1 = vadd.f32 %v2836_v63, %v2024_v59  ;;  %v2752_v2 = vpop.f32.mrb[5].mxu0  ;;  %v2838_v3 = vpop.f32.mrb[5].mxu1  ;;  %v5026_v63 = vld [vmem:[#allocation13] ss:$0 sm:$0xff] }
 0x353   :  { %v4012_v4 = vadd.f32 %v2752_v2, %v2020_v60  ;;  %v4016_v5 = vadd.f32 %v2838_v3, %v2028_v61  ;;  %v2754_v6 = vpop.f32.mrb[6].mxu0  ;;  %v2840_v7 = vpop.f32.mrb[6].mxu1 }
 0x354   :  { %v3846_v44 = vmul.f32 -1.442695, %v4011_v0  ;;  %v3848_v8 = vmul.f32 -1.442695, %v4015_v1  ;;  %v4013_v9 = vadd.f32 %v2754_v6, %v2016_v58  ;;  %v4017_v45 = vadd.f32 %v2840_v7, %v2024_v59  ;;  %v2756_v10 = vpop.f32.mrb[7].mxu0  ;;  %v2842_v11 = vpop.f32.mrb[7].mxu1 }
 0x355   :  { %v3847_v47 = vmul.f32 -1.442695, %v4012_v4  ;;  %v3849_v12 = vmul.f32 -1.442695, %v4016_v5  ;;  %v4014_v43 = vadd.f32 %v2756_v10, %v2020_v60  ;;  %v4018_v48 = vadd.f32 %v2842_v11, %v2028_v61 }
 0x356   :  { %4637 = vpow2.f32 %v3846_v44  ;;  %v3850_v13 = vmul.f32 -1.442695, %v4013_v9  ;;  %v3852_v15 = vmul.f32 -1.442695, %v4017_v45  ;;  %v4869_v6 = vmov 0.0  }
 0x357   :  { %4639 = vpow2.f32 %v3848_v8  ;;  %v3851_v16 = vmul.f32 -1.442695, %v4014_v43  ;;  %v3853_v17 = vmul.f32 -1.442695, %v4018_v48 }
 0x358   :  { %4641 = vpow2.f32 %v3847_v47 }
 0x359   :  { %4643 = vpow2.f32 %v3849_v12 }
 0x35a   :  { %4645 = vpow2.f32 %v3850_v13 }
 0x35b   :  { %4647 = vpow2.f32 %v3852_v15 }
 0x35c   :  { %4649 = vpow2.f32 %v3851_v16 }
 0x35d   :  { %4651 = vpow2.f32 %v3853_v17 }
 0x360   :  { %v4638_v18 = vpop.eup %4637 }
 0x361   :  { %v4640_v19 = vpop.eup %4639  ;;  %v2869_v20 = vadd.f32 1.0, %v4638_v18 }
 0x362   :  { %v4642_v21 = vpop.eup %4641  ;;  %v2871_v22 = vadd.f32 1.0, %v4640_v19 }
 0x363   :  { %v4644_v23 = vpop.eup %4643  ;;  %4653 = vrcp.f32 %v2869_v20  ;;  %v2870_v24 = vadd.f32 1.0, %v4642_v21 }
 0x364   :  { %v4646_v25 = vpop.eup %4645  ;;  %4655 = vrcp.f32 %v2871_v22  ;;  %v2872_v26 = vadd.f32 1.0, %v4644_v23 }
 0x365   :  { %v4648_v27 = vpop.eup %4647  ;;  %4657 = vrcp.f32 %v2870_v24  ;;  %v2873_v28 = vadd.f32 1.0, %v4646_v25 }
 0x366   :  { %v4650_v29 = vpop.eup %4649  ;;  %4659 = vrcp.f32 %v2872_v26  ;;  %v2875_v30 = vadd.f32 1.0, %v4648_v27 }
 0x367   :  { %v4652_v31 = vpop.eup %4651  ;;  %4661 = vrcp.f32 %v2873_v28  ;;  %v2874_v14 = vadd.f32 1.0, %v4650_v29 }
 0x368   :  { %4663 = vrcp.f32 %v2875_v30  ;;  %v2876_v32 = vadd.f32 1.0, %v4652_v31 }
 0x369   :  { %4665 = vrcp.f32 %v2874_v14 }
 0x36a   :  { %4667 = vrcp.f32 %v2876_v32 }
 0x36d   :  { %v4654_v33 = vpop.eup %4653 }
 0x36e   :  { %v4656_v34 = vpop.eup %4655 }
 0x36f   :  { %v4658_v35 = vpop.eup %4657 }
 0x370   :  { %v4660_v36 = vpop.eup %4659 }
 0x371   :  { %v4662_v37 = vpop.eup %4661 }
 0x372   :  { %v4664_v38 = vpop.eup %4663  ;;  %v2893_v39 = vpack.c.bf16 %v4662_v37, %v4654_v33 }
 0x373   :  { %v4666_v40 = vpop.eup %4665  ;;  %v2895_v41 = vpack.c.bf16 %v4664_v38, %v4656_v34 }
 0x374   :  { %v4668_v42 = vpop.eup %4667  ;;  %v2894_v46 = vpack.c.bf16 %v4666_v40, %v4658_v35 }
 0x375   :  { %v2896_v49 = vpack.c.bf16 %v4668_v42, %v4660_v36 }
 0x376   :  { %3185 = vmatprep.mubr.bf16.mxu0 %v2894_v46 }
 0x377   :  { %3226 = vmatprep.mubr.bf16.mxu1 %v2896_v49  ;;  %3186 = vmatmul.mubr.bf16.vlgmr.msra.gmra.mrb[8].mxu0 %v2893_v39 }
 0x378   :  { %3227 = vmatmul.mubr.bf16.vlgmr.msra.gmra.mrb[8].mxu1 %v2895_v41 }
 0x44a   :  { %v3975_v50 = vpop.f32.mrb[8].mxu0 }
 0x44b   :  { %v3997_v51 = vpop.f32.mrb[8].mxu1  ;;  %v3976_v52 = vpop.f32.mrb[9].mxu0 }
 0x44c   :  { %v3977_v53 = vadd.f32 %v3976_v52, %v3975_v50  ;;  %v3998_v54 = vpop.f32.mrb[9].mxu1  ;;  %v3978_v55 = vpop.f32.mrb[10].mxu0 }
 0x44d   :  { %v3999_v56 = vadd.f32 %v3998_v54, %v3997_v51  ;;  %v4000_v57 = vpop.f32.mrb[10].mxu1  ;;  %v3979_v58 = vpop.f32.mrb[11].mxu0 }
 0x44e   :  { %v3980_v59 = vadd.f32 %v3979_v58, %v3978_v55  ;;  %v4001_v60 = vpop.f32.mrb[11].mxu1 }
 0x44f   :  { %v5024_v61 = vadd.f32 %v3999_v56, %v3977_v53  ;;  %v4002_v62 = vadd.f32 %v4001_v60, %v4000_v57 }
 0x451   :  { %v5028_v0 = vadd.f32 %v4002_v62, %v3980_v59  ;;  %v3242_v1 = vmul.f32 0.0, %v5024_v61  ;;  %v3264_v4 = vmul.f32 0.41092134, %v5024_v61  ;;  %v3293_v16 = vmul.f32 0.88211673, %v5024_v61 }
 0x452   :  { %v3322_v31 = vmul.f32 1.3046962, %v5024_v61  ;;  %v3351_v50 = vmul.f32 1.65426, %v5024_v61 }
 0x453   :  { %v3243_v2 = vmul.f32 0.0, %v5028_v0  ;;  %v3244_v3 = vadd.f32 %v5026_v63, %v3242_v1  ;;  %v3265_v44 = vmul.f32 0.41092134, %v5028_v0  ;;  %v3266_v10 = vadd.f32 %v5026_v63, %v3264_v4 }
 0x454   :  { %v3294_v19 = vmul.f32 0.88211673, %v5028_v0  ;;  %v3295_v23 = vadd.f32 %v5026_v63, %v3293_v16  ;;  %v3323_v33 = vmul.f32 1.3046962, %v5028_v0  ;;  %v3324_v37 = vadd.f32 %v5026_v63, %v3322_v31 }
 0x455   :  { %v3245_v5 = vadd.f32 %v5026_v63, %v3243_v2  ;;  %vm3248_vm0 = vcmp.gt.f32.partialorder %v3244_v3, 1.0  ;;  %v3268_v8 = vmul.f32 0.7788008, %v3244_v3  ;;  %v3267_v48 = vadd.f32 %v5026_v63, %v3265_v44 }
 0x456   :  { %v3887_v7 = vsel %vm3248_vm0, 1.0, %v4869_v6  ;;  %v3296_v28 = vadd.f32 %v5026_v63, %v3294_v19  ;;  %v3325_v42 = vadd.f32 %v5026_v63, %v3323_v33  ;;  %v3352_v53 = vmul.f32 1.65426, %v5028_v0 }
 0x457   :  { %vm3249_vm1 = vcmp.gt.f32.partialorder %v3245_v5, 1.0  ;;  %v3270_v9 = vsub.f32 1.0, %v3887_v7  ;;  %v3269_v47 = vmul.f32 0.7788008, %v3245_v5  ;;  %v3353_v57 = vadd.f32 %v5026_v63, %v3351_v50 }
 0x458   :  { %v3888_v45 = vsel %vm3249_vm1, 1.0, %v4869_v6  ;;  %v3354_v1 = vadd.f32 %v5026_v63, %v3352_v53  ;;  %v3380_v4 = vmul.f32 1.9340268, %v5024_v61  ;;  %v3381_v44 = vmul.f32 1.9340268, %v5028_v0 }
 0x459   :  { %v3936_v11 = vpack.c.bf16 %v3888_v45, %v3887_v7  ;;  %v3271_v12 = vsub.f32 1.0, %v3888_v45  ;;  %v3272_v43 = vmul.f32 %v3270_v9, %v3268_v8  ;;  %v3409_v16 = vmul.f32 2.1546783, %v5024_v61 }
 0x45a   :  { %v3410_v19 = vmul.f32 2.1546783, %v5028_v0  ;;  %v3438_v31 = vmul.f32 2.3275404, %v5024_v61  ;;  %v3439_v33 = vmul.f32 2.3275404, %v5028_v0 }
 0x45b   :  { %3937 = vst [vmem:[#allocation14] sm:$0xff] %v3936_v11   ;;  %v3273_v13 = vmul.f32 %v3271_v12, %v3269_v47  ;;  %v3274_v15 = vadd.f32 %v3272_v43, %v3266_v10  ;;  %v3382_v10 = vadd.f32 %v5026_v63, %v3380_v4 }
 0x45c   :  { %v3441_v61 = vadd.f32 %v5026_v63, %v3439_v33 }
 0x45d   :  { %v3275_v17 = vadd.f32 %v3273_v13, %v3267_v48  ;;  %vm3276_vm2 = vcmp.gt.f32.partialorder %v3274_v15, 1.0  ;;  %v3297_v20 = vmul.f32 0.7788008, %v3274_v15  ;;  %v3383_v48 = vadd.f32 %v5026_v63, %v3381_v44 }
 0x45e   :  { %v3891_v18 = vsel %vm3276_vm2, 1.0, %v4869_v6 }
 0x45f   :  { %vm3277_vm3 = vcmp.gt.f32.partialorder %v3275_v17, 1.0  ;;  %v3299_v21 = vsub.f32 1.0, %v3891_v18  ;;  %v3298_v25 = vmul.f32 0.7788008, %v3275_v17 }
 0x460   :  { %v3892_v22 = vsel %vm3277_vm3, 1.0, %v4869_v6 }
 0x461   :  { %v3939_v24 = vpack.c.bf16 %v3892_v22, %v3891_v18  ;;  %v3300_v26 = vsub.f32 1.0, %v3892_v22  ;;  %v3301_v27 = vmul.f32 %v3299_v21, %v3297_v20 }
 0x463   :  { %3940 = vst [vmem:[#allocation14 + $0x8] sm:$0xff] %v3939_v24   ;;  %v3302_v29 = vmul.f32 %v3300_v26, %v3298_v25  ;;  %v3303_v30 = vadd.f32 %v3301_v27, %v3295_v23  ;;  %v3411_v23 = vadd.f32 %v5026_v63, %v3409_v16 }
 0x465   :  { %v3304_v14 = vadd.f32 %v3302_v29, %v3296_v28  ;;  %vm3305_vm4 = vcmp.gt.f32.partialorder %v3303_v30, 1.0  ;;  %v3326_v34 = vmul.f32 0.7788008, %v3303_v30  ;;  %v3412_v28 = vadd.f32 %v5026_v63, %v3410_v19 }
 0x466   :  { %v3895_v32 = vsel %vm3305_vm4, 1.0, %v4869_v6 }
 0x467   :  { %vm3306_vm5 = vcmp.gt.f32.partialorder %v3304_v14, 1.0  ;;  %v3328_v35 = vsub.f32 1.0, %v3895_v32  ;;  %v3327_v39 = vmul.f32 0.7788008, %v3304_v14 }
 0x468   :  { %v3896_v36 = vsel %vm3306_vm5, 1.0, %v4869_v6 }
 0x469   :  { %v3942_v38 = vpack.c.bf16 %v3896_v36, %v3895_v32  ;;  %v3329_v40 = vsub.f32 1.0, %v3896_v36  ;;  %v3330_v41 = vmul.f32 %v3328_v35, %v3326_v34 }
 0x46b   :  { %3943 = vst [vmem:[#allocation14 + $0x10] sm:$0xff] %v3942_v38   ;;  %v3331_v46 = vmul.f32 %v3329_v40, %v3327_v39  ;;  %v3332_v49 = vadd.f32 %v3330_v41, %v3324_v37  ;;  %v3440_v37 = vadd.f32 %v5026_v63, %v3438_v31 }
 0x46d   :  { %v3333_v51 = vadd.f32 %v3331_v46, %v3325_v42  ;;  %vm3334_vm6 = vcmp.gt.f32.partialorder %v3332_v49, 1.0  ;;  %v3355_v54 = vmul.f32 0.7788008, %v3332_v49 }
 0x46e   :  { %v3899_v52 = vsel %vm3334_vm6, 1.0, %v4869_v6 }
 0x46f   :  { %vm3335_vm7 = vcmp.gt.f32.partialorder %v3333_v51, 1.0  ;;  %v3357_v55 = vsub.f32 1.0, %v3899_v52  ;;  %v3356_v59 = vmul.f32 0.7788008, %v3333_v51 }
 0x470   :  { %v3900_v56 = vsel %vm3335_vm7, 1.0, %v4869_v6 }
 0x471   :  { %v3945_v58 = vpack.c.bf16 %v3900_v56, %v3899_v52  ;;  %v3358_v60 = vsub.f32 1.0, %v3900_v56  ;;  %v3359_v62 = vmul.f32 %v3357_v55, %v3355_v54 }
 0x473   :  { %3946 = vst [vmem:[#allocation14 + $0x18] sm:$0xff] %v3945_v58   ;;  %v3360_v2 = vmul.f32 %v3358_v60, %v3356_v59  ;;  %v3361_v3 = vadd.f32 %v3359_v62, %v3353_v57 }
 0x475   :  { %v3362_v5 = vadd.f32 %v3360_v2, %v3354_v1  ;;  %vm3363_vm8 = vcmp.gt.f32.partialorder %v3361_v3, 1.0  ;;  %v3384_v8 = vmul.f32 0.7788008, %v3361_v3 }
 0x476   :  { %v3903_v7 = vsel %vm3363_vm8, 1.0, %v4869_v6 }
 0x477   :  { %vm3364_vm9 = vcmp.gt.f32.partialorder %v3362_v5, 1.0  ;;  %v3386_v9 = vsub.f32 1.0, %v3903_v7  ;;  %v3385_v47 = vmul.f32 0.7788008, %v3362_v5 }
 0x478   :  { %v3904_v45 = vsel %vm3364_vm9, 1.0, %v4869_v6 }
 0x479   :  { %v3948_v11 = vpack.c.bf16 %v3904_v45, %v3903_v7  ;;  %v3387_v12 = vsub.f32 1.0, %v3904_v45  ;;  %v3388_v43 = vmul.f32 %v3386_v9, %v3384_v8 }
 0x47b   :  { %3949 = vst [vmem:[#allocation14 + $0x20] sm:$0xff] %v3948_v11   ;;  %v3389_v13 = vmul.f32 %v3387_v12, %v3385_v47  ;;  %v3390_v15 = vadd.f32 %v3388_v43, %v3382_v10 }
 0x47d   :  { %v3391_v17 = vadd.f32 %v3389_v13, %v3383_v48  ;;  %vm3392_vm10 = vcmp.gt.f32.partialorder %v3390_v15, 1.0  ;;  %v3413_v20 = vmul.f32 0.7788008, %v3390_v15 }
 0x47e   :  { %v3907_v18 = vsel %vm3392_vm10, 1.0, %v4869_v6 }
 0x47f   :  { %vm3393_vm11 = vcmp.gt.f32.partialorder %v3391_v17, 1.0  ;;  %v3415_v21 = vsub.f32 1.0, %v3907_v18  ;;  %v3414_v25 = vmul.f32 0.7788008, %v3391_v17 }
 0x480   :  { %v3908_v22 = vsel %vm3393_vm11, 1.0, %v4869_v6 }
 0x481   :  { %v3951_v24 = vpack.c.bf16 %v3908_v22, %v3907_v18  ;;  %v3416_v26 = vsub.f32 1.0, %v3908_v22  ;;  %v3417_v27 = vmul.f32 %v3415_v21, %v3413_v20 }
 0x483   :  { %3952 = vst [vmem:[#allocation14 + $0x28] sm:$0xff] %v3951_v24   ;;  %v3418_v29 = vmul.f32 %v3416_v26, %v3414_v25  ;;  %v3419_v30 = vadd.f32 %v3417_v27, %v3411_v23 }
 0x485   :  { %v3420_v14 = vadd.f32 %v3418_v29, %v3412_v28  ;;  %vm3421_vm12 = vcmp.gt.f32.partialorder %v3419_v30, 1.0  ;;  %v3442_v34 = vmul.f32 0.7788008, %v3419_v30 }
 0x486   :  { %v3911_v32 = vsel %vm3421_vm12, 1.0, %v4869_v6 }
 0x487   :  { %vm3422_vm13 = vcmp.gt.f32.partialorder %v3420_v14, 1.0  ;;  %v3444_v35 = vsub.f32 1.0, %v3911_v32  ;;  %v3443_v39 = vmul.f32 0.7788008, %v3420_v14 }
 0x488   :  { %v3912_v36 = vsel %vm3422_vm13, 1.0, %v4869_v6 }
 0x489   :  { %v3954_v38 = vpack.c.bf16 %v3912_v36, %v3911_v32  ;;  %v3445_v40 = vsub.f32 1.0, %v3912_v36  ;;  %v3446_v41 = vmul.f32 %v3444_v35, %v3442_v34 }
 0x48b   :  { %3955 = vst [vmem:[#allocation14 + $0x30] sm:$0xff] %v3954_v38   ;;  %v3447_v42 = vmul.f32 %v3445_v40, %v3443_v39  ;;  %v3448_v46 = vadd.f32 %v3446_v41, %v3440_v37 }
 0x48d   :  { %v3449_v49 = vadd.f32 %v3447_v42, %v3441_v61  ;;  %vm3450_vm14 = vcmp.gt.f32.partialorder %v3448_v46, 1.0 }
 0x48e   :  { %v3915_v0 = vsel %vm3450_vm14, 1.0, %v4869_v6 }
 0x48f   :  { %vm3451_vm15 = vcmp.gt.f32.partialorder %v3449_v49, 1.0 }
 0x490   :  { %v3916_v50 = vsel %vm3451_vm15, 1.0, %v4869_v6 }
 0x491   :  { %v3957_v51 = vpack.c.bf16 %v3916_v50, %v3915_v0 }
 0x493   :  { %3958 = vst [vmem:[#allocation14 + $0x38] sm:$0xff] %v3957_v51  }
 0x494   :  { %4834 = shalt.err (!%p4831_p4)
}
 0x495   :  { %s4835_s20 = scalar_lea.hbm %s5100_s7, 1024 }
 0x496   :  { %p4836_p5 = scmp.ne.s32.totalorder %s5100_s7, %s4835_s20  ;;  %p4839_p6 = scmp.lt.u32.totalorder %s4835_s20, %s5100_s7 }
 0x498   :  { %p4841_p7 = pnand %p4839_p6, %p4836_p5 }
 0x49a   :  { %4844 = shalt.err (!%p4841_p7)
}
 0x49b   :  { %3478 = dma.vmem_to_hbm [thread:$0]  %s3473_s16, 1024, %s5100_s7, [#allocation4], %s4860_s3, %s4860_s3, %s4861_s11  }
 0x49c   :  { %4853 = dma.done.wait [#allocation4], 1024  }
 0x49d   :  { %4854 = vsyncadd [#allocation4], 4294966272 }
 0x49e   :  { %3482 = vsyncpa [#allocation3], 1 }
 0x49f   :  { %3483 = vsyncpa [#allocation6], 1 }
 0x4a0   :  { %3484 = vsyncpa [#allocation9], 1 }
 0x4a1   :  { %3485 = vsyncpa [#allocation12], 1 }
 0x4a2   :  { %3486 = vsyncpa [#allocation4], 1 }

</bundles_post_ra>
